<compile_context>
chip_gen: v7x
topology: tpu7x:2x2x1
jax: 0.10.0
libtpu: 0.0.40
codegen_flags: <defaults>
</compile_context>

<pallas_src>
import jax
import jax.numpy as jnp
from jax.experimental import pallas as pl
from jax.experimental.pallas import tpu as pltpu


def _round_up(x, m):
    return ((x + m - 1) // m) * m


def _vmem_budget_bytes():
    """Per-core VMEM budget: ~75% of physical, capped at 100 MiB."""
    phys = 64 * 1024 * 1024            # conservative fallback (v7x per-TC)
    try:
        phys = int(pltpu.get_tpu_info().vmem_capacity_bytes)
    except Exception:
        pass
    return max(32 * 1024 * 1024, min((phys * 3) // 4, 100 * 1024 * 1024))


def _tile_fits(tn, tb, in_size, hidden, budget):
    """Rough VMEM footprint check for one (tb, tn) grid step, double-buffered."""
    blk = 4 * tn
    wgt = (in_size + hidden) * blk * 2 + 8 * blk * 4      # bf16 W+U, f32 bias (sublane-padded)
    acts = tb * (in_size + hidden + tn) * 4                # x, h, c blocks (f32)
    outs = 2 * tb * tn * 4                                 # H, C blocks
    temps = 4 * tb * blk * 4                               # in-kernel f32 temporaries
    return 2 * (wgt + acts + outs) + temps <= budget


def lstm_cell_kernel(x_ref, h_ref, c_ref, w_ref, u_ref, b_ref,
                     h_out_ref, c_out_ref):
    """One (TB batch, TN hidden) tile of the LSTM cell.

    w_ref / u_ref / b_ref hold the four gate projections for this hidden tile
    packed side by side as [I | O | F | C], so a single bf16 MXU matmul of
    lane width 4*TN computes all four gate pre-activations at once (f32 acc).
    """
    x = x_ref[...].astype(jnp.bfloat16)
    h = h_ref[...].astype(jnp.bfloat16)

    gates = (
        jnp.dot(x, w_ref[...], preferred_element_type=jnp.float32)
        + jnp.dot(h, u_ref[...], preferred_element_type=jnp.float32)
        + b_ref[...]                                       # f32 bias, broadcast over rows
    )

    tn = gates.shape[-1] // 4
    i_pre = gates[:, 0 * tn:1 * tn]
    o_pre = gates[:, 1 * tn:2 * tn]
    f_pre = gates[:, 2 * tn:3 * tn]
    c_head = gates[:, 3 * tn:4 * tn]   # NOTE: no tanh on candidate, per module.

    # sigmoid(x) = 0.5 * (1 + tanh(0.5 x)): one EUP op + one FMA per gate.
    gate_i = 0.5 * (jnp.tanh(0.5 * i_pre) + 1.0)
    gate_o = 0.5 * (jnp.tanh(0.5 * o_pre) + 1.0)
    gate_f = 0.5 * (jnp.tanh(0.5 * f_pre) + 1.0)

    c_prev = c_ref[...].astype(jnp.float32)
    c_new = gate_f * c_prev + gate_i * c_head
    h_new = gate_o * jnp.tanh(c_new)

    h_out_ref[...] = h_new.astype(h_out_ref.dtype)
    c_out_ref[...] = c_new.astype(c_out_ref.dtype)


def _pack_gates(mats, tn):
    """mats: 4 arrays (K, hidden_pad) in gate order [i, o, f, c].

    Returns (K, (hidden_pad // tn) * 4 * tn) laid out so the block for hidden
    tile j is [I_j | O_j | F_j | C_j] (each tn lanes wide)."""
    k_dim, h_dim = mats[0].shape
    nt = h_dim // tn
    stacked = jnp.stack([m.reshape(k_dim, nt, tn) for m in mats], axis=2)
    return stacked.reshape(k_dim, nt * 4 * tn)


def _pad_cols(m, width):
    return m if m.shape[1] == width else jnp.pad(m, ((0, 0), (0, width - m.shape[1])))


def lstm_cell_forward(incoming, state, params):
    """incoming: (B, input_size); state: (h, c) each (B, hidden_size).

    params: PyTorch-layout weights W_i/W_o/W_f/W_c (H, in), U_i/U_o/U_f/U_c
    (H, H) and biases b_W_*/b_U_* (H,). Returns (H, (H, C)) like the module."""
    h_prev, c_prev = state
    batch, in_size = incoming.shape
    hidden = h_prev.shape[1]
    dtype = incoming.dtype

    # ---- tiling ---------------------------------------------------------
    # Batch: pad to a sublane multiple; never fall back to tb=8 for big batch.
    if batch <= 128:
        b_pad = _round_up(batch, 8)
        tb = b_pad
    else:
        b_pad = _round_up(batch, 128)
        tb = 128
    n_b = b_pad // tb

    # Hidden: pad each gate to a 128-lane multiple; pick the largest tile that
    # fits the (double-buffered) VMEM budget.
    hidden_pad = _round_up(hidden, 128)
    budget = _vmem_budget_bytes()
    cands = []
    if hidden_pad <= 512:
        cands.append(hidden_pad)
    for t in (512, 256, 128):
        if hidden_pad % t == 0 and t not in cands:
            cands.append(t)
    tn = cands[-1]
    for t in cands:
        if _tile_fits(t, tb, in_size, hidden, budget):
            tn = t
            break
    n_n = hidden_pad // tn

    # ---- pad batch (and hidden of c) ------------------------------------
    if b_pad != batch:
        pad = ((0, b_pad - batch), (0, 0))
        incoming = jnp.pad(incoming, pad)
        h_prev = jnp.pad(h_prev, pad)
        c_prev = jnp.pad(c_prev, pad)
    if hidden_pad != hidden:
        c_prev = jnp.pad(c_prev, ((0, 0), (0, hidden_pad - hidden)))

    # ---- fuse the four gates into lane-dense weight slabs ----------------
    # nn.Linear stores (out, in); transpose to (in, out) for x @ W.
    w_pack = _pack_gates(
        [_pad_cols(params[k].T, hidden_pad) for k in ("W_i", "W_o", "W_f", "W_c")],
        tn).astype(jnp.bfloat16)
    u_pack = _pack_gates(
        [_pad_cols(params[k].T, hidden_pad) for k in ("U_i", "U_o", "U_f", "U_c")],
        tn).astype(jnp.bfloat16)
    b_pack = _pack_gates(
        [_pad_cols((params["b_" + wk] + params["b_" + uk]).reshape(1, hidden),
                   hidden_pad)
         for wk, uk in (("W_i", "U_i"), ("W_o", "U_o"),
                        ("W_f", "U_f"), ("W_c", "U_c"))],
        tn).astype(jnp.float32)

    weight_bytes = (in_size + hidden) * 4 * hidden_pad * 2 + 4 * hidden_pad * 4
    act_read_bytes = n_n * b_pad * (in_size + hidden) * 4 + b_pad * hidden_pad * 4
    out_bytes = 2 * b_pad * hidden_pad * 4
    cost = pl.CostEstimate(
        flops=2 * b_pad * (in_size + hidden) * 4 * hidden_pad + 10 * b_pad * hidden_pad,
        transcendentals=4 * b_pad * hidden_pad,
        bytes_accessed=weight_bytes + act_read_bytes + out_bytes,
    )

    out_shape = (jax.ShapeDtypeStruct((b_pad, hidden_pad), dtype),
                 jax.ShapeDtypeStruct((b_pad, hidden_pad), dtype))

    h_out, c_out = pl.pallas_call(
        lstm_cell_kernel,
        out_shape=out_shape,
        grid_spec=pltpu.PrefetchScalarGridSpec(
            num_scalar_prefetch=0,
            # hidden tiles outer, batch tiles inner -> weight block stays
            # resident in VMEM across the batch loop.
            grid=(n_n, n_b),
            in_specs=[
                pl.BlockSpec((tb, in_size), lambda nj, bi: (bi, 0)),       # x
                pl.BlockSpec((tb, hidden), lambda nj, bi: (bi, 0)),        # h
                pl.BlockSpec((tb, tn), lambda nj, bi: (bi, nj)),           # c
                pl.BlockSpec((in_size, 4 * tn), lambda nj, bi: (0, nj)),   # W (bf16)
                pl.BlockSpec((hidden, 4 * tn), lambda nj, bi: (0, nj)),    # U (bf16)
                pl.BlockSpec((1, 4 * tn), lambda nj, bi: (0, nj)),         # b (f32)
            ],
            out_specs=[
                pl.BlockSpec((tb, tn), lambda nj, bi: (bi, nj)),           # H
                pl.BlockSpec((tb, tn), lambda nj, bi: (bi, nj)),           # C
            ],
        ),
        compiler_params=pltpu.CompilerParams(
            dimension_semantics=("parallel", "parallel"),
            vmem_limit_bytes=budget,
        ),
        cost_estimate=cost,
    )(incoming, h_prev, c_prev, w_pack, u_pack, b_pack)

    h_out = h_out[:batch, :hidden]
    c_out = c_out[:batch, :hidden]
    return h_out, (h_out, c_out)


def init_params(key, input_size, hidden_size, dtype=jnp.float32):
    """Deterministic init mimicking nn.Linear (uniform +/- 1/sqrt(fan_in)),
    stored in PyTorch layout: weight (out, in), bias (out,)."""
    names = [("W_i", input_size), ("W_o", input_size),
             ("W_f", input_size), ("W_c", input_size),
             ("U_i", hidden_size), ("U_o", hidden_size),
             ("U_f", hidden_size), ("U_c", hidden_size)]
    keys = jax.random.split(key, 2 * len(names))
    params = {}
    for idx, (name, fan_in) in enumerate(names):
        bound = 1.0 / (fan_in ** 0.5)
        params[name] = jax.random.uniform(
            keys[2 * idx], (hidden_size, fan_in), dtype, -bound, bound)
        params["b_" + name] = jax.random.uniform(
            keys[2 * idx + 1], (hidden_size,), dtype, -bound, bound)
    return params


def lstm_cell_reference(incoming, state, params):
    """Pure-JAX f32 reference matching the PyTorch module."""
    h, c = state
    hp = jax.lax.Precision.HIGHEST

    def lin(x, name):
        return jnp.dot(x, params[name].T, precision=hp) + params["b_" + name]

    gate_i = jax.nn.sigmoid(lin(incoming, "W_i") + lin(h, "U_i"))
    gate_o = jax.nn.sigmoid(lin(incoming, "W_o") + lin(h, "U_o"))
    gate_f = jax.nn.sigmoid(lin(incoming, "W_f") + lin(h, "U_f"))
    c_head = lin(incoming, "W_c") + lin(h, "U_c")
    c_new = gate_f * c + gate_i * c_head
    h_new = gate_o * jnp.tanh(c_new)
    return h_new, (h_new, c_new)


if __name__ == "__main__":
    root = jax.random.PRNGKey(0)

    # Case 1: lane-aligned hidden, single 384-wide tile (batch padded 2->8).
    # Case 2: small / unaligned hidden (padded to one 128-lane tile).
    # Case 3: hidden=640 -> multi hidden-tile grid (tn=128, n_n=5).
    for (batch, input_size, hidden_size) in [(2, 16, 384), (3, 10, 32), (4, 20, 640)]:
        k_param, k_x, k_h, k_c = jax.random.split(
            jax.random.fold_in(root, hidden_size), 4)

        params = init_params(k_param, input_size, hidden_size)
        incoming = jax.random.normal(k_x, (batch, input_size), jnp.float32)
        h0 = jax.random.normal(k_h, (batch, hidden_size), jnp.float32)
        c0 = jax.random.normal(k_c, (batch, hidden_size), jnp.float32)

        h_new, (h_same, c_new) = lstm_cell_forward(incoming, (h0, c0), params)
        h_new = jax.block_until_ready(h_new)
        c_new = jax.block_until_ready(c_new)

        h_ref, (_, c_ref) = lstm_cell_reference(incoming, (h0, c0), params)

        assert h_new.shape == (batch, hidden_size)
        assert c_new.shape == (batch, hidden_size)
        # Tolerance relaxed vs. the f32 HIGHEST reference because the kernel
        # uses bf16 weights / bf16 MXU inputs with f32 accumulation.
        assert jnp.allclose(h_new, h_ref, atol=2e-2, rtol=2e-2), "H mismatch"
        assert jnp.allclose(c_new, c_ref, atol=2e-2, rtol=2e-2), "C mismatch"

    print("KERNEL_OK")
</pallas_src>

<mosaic_0001>
module attributes {stable_mosaic.version = 11 : i64} {
  func.func @lstm_cell_kernel(%arg0: i32, %arg1: i32, %arg2: memref<8x16xf32, #tpu.memory_space<vmem>>, %arg3: memref<8x384xf32, #tpu.memory_space<vmem>>, %arg4: memref<8x384xf32, #tpu.memory_space<vmem>>, %arg5: memref<16x1536xbf16, #tpu.memory_space<vmem>>, %arg6: memref<384x1536xbf16, #tpu.memory_space<vmem>>, %arg7: memref<1x1536xf32, #tpu.memory_space<vmem>>, %arg8: memref<8x384xf32, #tpu.memory_space<vmem>>, %arg9: memref<8x384xf32, #tpu.memory_space<vmem>>) attributes {dimension_semantics = [#tpu.dimension_semantics<parallel>, #tpu.dimension_semantics<parallel>], iteration_bounds = array<i64: 1, 1>, scalar_prefetch = 0 : i64, scratch_operands = 0 : i64, tpu.core_type = #tpu.core_type<tc>, window_params = [{transform_indices = @transform_0, window_bounds = array<i64: 8, 16>}, {transform_indices = @transform_1, window_bounds = array<i64: 8, 384>}, {transform_indices = @transform_2, window_bounds = array<i64: 8, 384>}, {transform_indices = @transform_3, window_bounds = array<i64: 16, 1536>}, {transform_indices = @transform_4, window_bounds = array<i64: 384, 1536>}, {transform_indices = @transform_5, window_bounds = array<i64: 1, 1536>}, {transform_indices = @transform_6, window_bounds = array<i64: 8, 384>}, {transform_indices = @transform_7, window_bounds = array<i64: 8, 384>}]} {
    %c0 = arith.constant 0 : index
    %c0_0 = arith.constant 0 : index
    %0 = vector.load %arg2[%c0, %c0_0] : memref<8x16xf32, #tpu.memory_space<vmem>>, vector<8x16xf32>
    %1 = arith.truncf %0 : vector<8x16xf32> to vector<8x16xbf16>
    %c0_1 = arith.constant 0 : index
    %c0_2 = arith.constant 0 : index
    %2 = vector.load %arg3[%c0_1, %c0_2] : memref<8x384xf32, #tpu.memory_space<vmem>>, vector<8x384xf32>
    %3 = arith.truncf %2 : vector<8x384xf32> to vector<8x384xbf16>
    %c0_3 = arith.constant 0 : index
    %c0_4 = arith.constant 0 : index
    %4 = vector.load %arg5[%c0_3, %c0_4] : memref<16x1536xbf16, #tpu.memory_space<vmem>>, vector<16x1536xbf16>
    %cst = arith.constant dense<0.000000e+00> : vector<8x1536xf32>
    %5 = tpu.matmul %1, %4, %cst {dimension_numbers = #tpu.dot_dimension_numbers<[1], [0], [0], [1], [0, 0, 1, 1], [], []>} : vector<8x16xbf16>, vector<16x1536xbf16>, vector<8x1536xf32> -> vector<8x1536xf32>
    %c0_5 = arith.constant 0 : index
    %c0_6 = arith.constant 0 : index
    %6 = vector.load %arg6[%c0_5, %c0_6] : memref<384x1536xbf16, #tpu.memory_space<vmem>>, vector<384x1536xbf16>
    %cst_7 = arith.constant dense<0.000000e+00> : vector<8x1536xf32>
    %7 = tpu.matmul %3, %6, %cst_7 {dimension_numbers = #tpu.dot_dimension_numbers<[1], [0], [0], [1], [0, 0, 1, 1], [], []>} : vector<8x384xbf16>, vector<384x1536xbf16>, vector<8x1536xf32> -> vector<8x1536xf32>
    %8 = arith.addf %5, %7 : vector<8x1536xf32>
    %c0_8 = arith.constant 0 : index
    %c0_9 = arith.constant 0 : index
    %9 = vector.load %arg7[%c0_8, %c0_9] : memref<1x1536xf32, #tpu.memory_space<vmem>>, vector<1x1536xf32>
    %10 = vector.broadcast %9 : vector<1x1536xf32> to vector<8x1536xf32>
    %11 = arith.addf %8, %10 : vector<8x1536xf32>
    %12 = vector.extract_strided_slice %11 {offsets = [0, 0], sizes = [8, 384], strides = [1, 1]} : vector<8x1536xf32> to vector<8x384xf32>
    %13 = vector.extract_strided_slice %11 {offsets = [0, 384], sizes = [8, 384], strides = [1, 1]} : vector<8x1536xf32> to vector<8x384xf32>
    %14 = vector.extract_strided_slice %11 {offsets = [0, 768], sizes = [8, 384], strides = [1, 1]} : vector<8x1536xf32> to vector<8x384xf32>
    %15 = vector.extract_strided_slice %11 {offsets = [0, 1152], sizes = [8, 384], strides = [1, 1]} : vector<8x1536xf32> to vector<8x384xf32>
    %cst_10 = arith.constant 5.000000e-01 : f32
    %16 = vector.broadcast %cst_10 : f32 to vector<8x384xf32>
    %17 = arith.mulf %16, %12 : vector<8x384xf32>
    %18 = math.tanh %17 : vector<8x384xf32>
    %cst_11 = arith.constant 1.000000e+00 : f32
    %19 = vector.broadcast %cst_11 : f32 to vector<8x384xf32>
    %20 = arith.addf %18, %19 : vector<8x384xf32>
    %cst_12 = arith.constant 5.000000e-01 : f32
    %21 = vector.broadcast %cst_12 : f32 to vector<8x384xf32>
    %22 = arith.mulf %21, %20 : vector<8x384xf32>
    %cst_13 = arith.constant 5.000000e-01 : f32
    %23 = vector.broadcast %cst_13 : f32 to vector<8x384xf32>
    %24 = arith.mulf %23, %13 : vector<8x384xf32>
    %25 = math.tanh %24 : vector<8x384xf32>
    %cst_14 = arith.constant 1.000000e+00 : f32
    %26 = vector.broadcast %cst_14 : f32 to vector<8x384xf32>
    %27 = arith.addf %25, %26 : vector<8x384xf32>
    %cst_15 = arith.constant 5.000000e-01 : f32
    %28 = vector.broadcast %cst_15 : f32 to vector<8x384xf32>
    %29 = arith.mulf %28, %27 : vector<8x384xf32>
    %cst_16 = arith.constant 5.000000e-01 : f32
    %30 = vector.broadcast %cst_16 : f32 to vector<8x384xf32>
    %31 = arith.mulf %30, %14 : vector<8x384xf32>
    %32 = math.tanh %31 : vector<8x384xf32>
    %cst_17 = arith.constant 1.000000e+00 : f32
    %33 = vector.broadcast %cst_17 : f32 to vector<8x384xf32>
    %34 = arith.addf %32, %33 : vector<8x384xf32>
    %cst_18 = arith.constant 5.000000e-01 : f32
    %35 = vector.broadcast %cst_18 : f32 to vector<8x384xf32>
    %36 = arith.mulf %35, %34 : vector<8x384xf32>
    %c0_19 = arith.constant 0 : index
    %c0_20 = arith.constant 0 : index
    %37 = vector.load %arg4[%c0_19, %c0_20] : memref<8x384xf32, #tpu.memory_space<vmem>>, vector<8x384xf32>
    %38 = arith.mulf %36, %37 : vector<8x384xf32>
    %39 = arith.mulf %22, %15 : vector<8x384xf32>
    %40 = arith.addf %38, %39 : vector<8x384xf32>
    %41 = math.tanh %40 : vector<8x384xf32>
    %42 = arith.mulf %29, %41 : vector<8x384xf32>
    %c0_21 = arith.constant 0 : index
    %c0_22 = arith.constant 0 : index
    %43 = vector.load %arg8[%c0_21, %c0_22] : memref<8x384xf32, #tpu.memory_space<vmem>>, vector<8x384xf32>
    tpu.vector_store %arg8[%c0_21, %c0_22], %42 {strides = array<i32>} : memref<8x384xf32, #tpu.memory_space<vmem>>, vector<8x384xf32>,
    %c0_23 = arith.constant 0 : index
    %c0_24 = arith.constant 0 : index
    %44 = vector.load %arg9[%c0_23, %c0_24] : memref<8x384xf32, #tpu.memory_space<vmem>>, vector<8x384xf32>
    tpu.vector_store %arg9[%c0_23, %c0_24], %40 {strides = array<i32>} : memref<8x384xf32, #tpu.memory_space<vmem>>, vector<8x384xf32>,
    return
  }
  func.func @transform_0(%arg0: i32, %arg1: i32) -> (i32, i32) {
    %c0_i32 = arith.constant 0 : i32
    %c0_i32_0 = arith.constant 0 : i32
    return %arg1, %c0_i32 : i32, i32
  }
  func.func @transform_1(%arg0: i32, %arg1: i32) -> (i32, i32) {
    %c0_i32 = arith.constant 0 : i32
    %c0_i32_0 = arith.constant 0 : i32
    return %arg1, %c0_i32 : i32, i32
  }
  func.func @transform_2(%arg0: i32, %arg1: i32) -> (i32, i32) {
    %c0_i32 = arith.constant 0 : i32
    return %arg1, %arg0 : i32, i32
  }
  func.func @transform_3(%arg0: i32, %arg1: i32) -> (i32, i32) {
    %c0_i32 = arith.constant 0 : i32
    %c0_i32_0 = arith.constant 0 : i32
    return %c0_i32, %arg0 : i32, i32
  }
  func.func @transform_4(%arg0: i32, %arg1: i32) -> (i32, i32) {
    %c0_i32 = arith.constant 0 : i32
    %c0_i32_0 = arith.constant 0 : i32
    return %c0_i32, %arg0 : i32, i32
  }
  func.func @transform_5(%arg0: i32, %arg1: i32) -> (i32, i32) {
    %c0_i32 = arith.constant 0 : i32
    %c0_i32_0 = arith.constant 0 : i32
    return %c0_i32, %arg0 : i32, i32
  }
  func.func @transform_6(%arg0: i32, %arg1: i32) -> (i32, i32) {
    %c0_i32 = arith.constant 0 : i32
    return %arg1, %arg0 : i32, i32
  }
  func.func @transform_7(%arg0: i32, %arg1: i32) -> (i32, i32) {
    %c0_i32 = arith.constant 0 : i32
    return %arg1, %arg0 : i32, i32
  }
}

</mosaic_0001>

<bundles_post_ra>
// kernel: tpu_custom_call.1
= control target key start
LH: loop header
LB: loop body
LE: loop exit
PB: predicated region body
PF: predicated region fallthrough
CT: control target
= control target key end

     0   :  { %13 = vsyncpa [#allocation3], 0  ;;  %s4060_s0 = inlined_call_operand.hbm [shape: f32[8,16], index: 0, kind: input, shape index: {}]   ;;  %s4061_s1 = inlined_call_operand.hbm [shape: f32[8,384], index: 1, kind: input, shape index: {}]   ;;  %s4062_s2 = inlined_call_operand.hbm [shape: f32[8,384], index: 2, kind: input, shape index: {}]   ;;  %s4063_s3 = inlined_call_operand.hbm [shape: bf16[16,1536], index: 3, kind: input, shape index: {}]   ;;  %s4064_s4 = inlined_call_operand.hbm [shape: bf16[384,1536], index: 4, kind: input, shape index: {}]   ;;  %s4065_s5 = inlined_call_operand.hbm [shape: f32[1,1536], index: 5, kind: input, shape index: {}]   ;;  %s4066_s6 = inlined_call_operand.hbm [shape: f32[8,384], index: 6, kind: output, shape index: {0}]   ;;  %s4067_s7 = inlined_call_operand.hbm [shape: f32[8,384], index: 7, kind: output, shape index: {1}]  }
   0x1   :  { %14 = vsyncpa [#allocation6], 0 }
   0x2   :  { %15 = vsyncpa [#allocation9], 0 }
   0x3   :  { %16 = vsyncpa [#allocation12], 0 }
   0x4   :  { %17 = vsyncpa [#allocation4], 0 }
   0x5   :  { %18 = vsyncpa [#allocation15], 0  ;;  %s3799_s24 = smov [#allocation5]   ;;  %s3800_s26 = smov [#allocation8]  }
   0x6   :  { %s35_s25 = sshll.u32 %s3799_s24, 4  ;;  %s54_s27 = sshll.u32 %s3800_s26, 4  ;;  %s36_s25 = int_to_ptr.vmem [resolvable:$true] %s35_s25  ;;  %s3850_s27 = int_to_ptr.vmem [resolvable:$true] %s54_s27 }
   0x7   :  { %s3611_s30 = scalar_lea.hbm %s4061_s1, 384 }
   0x8   :  { %p3612_p0 = scmp.ne.s32.totalorder %s4061_s1, %s3611_s30  ;;  %p3615_p1 = scmp.lt.u32.totalorder %s3611_s30, %s4061_s1 }
   0xa   :  { %p3617_p2 = pnand %p3615_p1, %p3612_p0 }
   0xc   :  { %3620 = shalt.err (!%p3617_p2)
}
   0xd   :  { %s3621_s12 = scalar_lea.vmem %s36_s25, 384  ;;  %p3626_p4 = scmp.lt.s32.totalorder %s36_s25, %s36_s25 }
   0xe   :  { %p3622_p3 = scmp.ne.s32.totalorder %s36_s25, %s3621_s12  ;;  %p3627_p5 = scmp.lt.s32.totalorder %s3621_s12, %s3621_s12 }
  0x10   :  { %p3628_p6 = por %p3627_p5, %p3626_p4 }
  0x12   :  { %p3629_p7 = pnand %p3628_p6, %p3622_p3 }
  0x14   :  { %3632 = shalt.err (!%p3629_p7)
}
  0x15   :  { %38 = dma.hbm_to_vmem [thread:$0]  %s4061_s1, 384, %s36_s25, [#allocation6]  }
  0x16   :  { %s3633_s17 = scalar_lea.hbm %s4063_s3, 1536 }
  0x17   :  { %p3634_p8 = scmp.ne.s32.totalorder %s4063_s3, %s3633_s17  ;;  %p3637_p9 = scmp.lt.u32.totalorder %s3633_s17, %s4063_s3 }
  0x19   :  { %p3639_p10 = pnand %p3637_p9, %p3634_p8 }
  0x1b   :  { %3642 = shalt.err (!%p3639_p10)
}
  0x1c   :  { %s3643_s22 = scalar_lea.vmem %s3850_s27, 1536  ;;  %p3648_p12 = scmp.lt.s32.totalorder %s3850_s27, %s3850_s27 }
  0x1d   :  { %p3644_p11 = scmp.ne.s32.totalorder %s3850_s27, %s3643_s22  ;;  %p3649_p13 = scmp.lt.s32.totalorder %s3643_s22, %s3643_s22 }
  0x1f   :  { %p3650_p0 = por %p3649_p13, %p3648_p12 }
  0x21   :  { %p3651_p1 = pnand %p3650_p0, %p3644_p11 }
  0x23   :  { %3654 = shalt.err (!%p3651_p1)
}
  0x24   :  { %s3801_s1 = smov 768   ;;  %s3802_s23 = smov 48  }
  0x25   :  { %60 = dma.hbm_to_vmem [thread:$0]  %s4063_s3, 1536, %s3850_s27, [#allocation9], %s3801_s1, %s3801_s1, %s3802_s23  }
  0x26   :  { %s3803_s26 = smov [#allocation2]   ;;  %s3804_s29 = smov [#allocation7]  }
  0x27   :  { %s25_s28 = sshll.u32 %s3803_s26, 4  ;;  %s45_s30 = sshll.u32 %s3804_s29, 4  ;;  %s26_s28 = int_to_ptr.vmem [resolvable:$true] %s25_s28  ;;  %s46_s30 = int_to_ptr.vmem [resolvable:$true] %s45_s30 }
  0x28   :  { %s3655_s10 = scalar_lea.hbm %s4060_s0, 128 }
  0x29   :  { %p3656_p2 = scmp.ne.s32.totalorder %s4060_s0, %s3655_s10  ;;  %p3659_p3 = scmp.lt.u32.totalorder %s3655_s10, %s4060_s0 }
  0x2b   :  { %p3661_p4 = pnand %p3659_p3, %p3656_p2 }
  0x2d   :  { %3664 = shalt.err (!%p3661_p4)
}
  0x2e   :  { %s3665_s3 = scalar_lea.vmem %s26_s28, 128  ;;  %p3670_p6 = scmp.lt.s32.totalorder %s26_s28, %s26_s28 }
  0x2f   :  { %p3666_p5 = scmp.ne.s32.totalorder %s26_s28, %s3665_s3  ;;  %p3671_p7 = scmp.lt.s32.totalorder %s3665_s3, %s3665_s3 }
  0x31   :  { %p3672_p8 = por %p3671_p7, %p3670_p6 }
  0x33   :  { %p3673_p9 = pnand %p3672_p8, %p3666_p5 }
  0x35   :  { %3676 = shalt.err (!%p3673_p9)
}
  0x36   :  { %28 = dma.hbm_to_vmem [thread:$0]  %s4060_s0, 128, %s26_s28, [#allocation3]  }
  0x37   :  { %s3677_s18 = scalar_lea.hbm %s4062_s2, 384 }
  0x38   :  { %p3678_p10 = scmp.ne.s32.totalorder %s4062_s2, %s3677_s18  ;;  %p3681_p11 = scmp.lt.u32.totalorder %s3677_s18, %s4062_s2 }
  0x3a   :  { %p3683_p12 = pnand %p3681_p11, %p3678_p10 }
  0x3c   :  { %3686 = shalt.err (!%p3683_p12)
}
  0x3d   :  { %s3687_s24 = scalar_lea.vmem %s46_s30, 384  ;;  %p3692_p0 = scmp.lt.s32.totalorder %s46_s30, %s46_s30 }
  0x3e   :  { %p3688_p13 = scmp.ne.s32.totalorder %s46_s30, %s3687_s24  ;;  %p3693_p1 = scmp.lt.s32.totalorder %s3687_s24, %s3687_s24 }
  0x40   :  { %p3694_p2 = por %p3693_p1, %p3692_p0 }
  0x42   :  { %p3695_p3 = pnand %p3694_p2, %p3688_p13 }
  0x44   :  { %3698 = shalt.err (!%p3695_p3)
}
  0x45   :  { %48 = dma.hbm_to_vmem [thread:$0]  %s4062_s2, 384, %s46_s30, [#allocation6]  }
  0x46   :  { %s3805_s26 = smov [#allocation10]   ;;  %s3806_s29 = smov [#allocation11]  }
  0x47   :  { %s66_s28 = sshll.u32 %s3805_s26, 4  ;;  %s79_s8 = sshll.u32 %s3806_s29, 4  ;;  %s67_s28 = int_to_ptr.vmem [resolvable:$true] %s66_s28  ;;  %s80_s8 = int_to_ptr.vmem [resolvable:$true] %s79_s8 }
  0x48   :  { %s3699_s11 = scalar_lea.hbm %s4064_s4, 36864 }
  0x49   :  { %p3700_p4 = scmp.ne.s32.totalorder %s4064_s4, %s3699_s11  ;;  %p3703_p5 = scmp.lt.u32.totalorder %s3699_s11, %s4064_s4 }
  0x4b   :  { %p3705_p6 = pnand %p3703_p5, %p3700_p4 }
  0x4d   :  { %3708 = shalt.err (!%p3705_p6)
}
  0x4e   :  { %s3709_s2 = scalar_lea.vmem %s67_s28, 36864  ;;  %p3714_p8 = scmp.lt.s32.totalorder %s67_s28, %s67_s28 }
  0x4f   :  { %p3710_p7 = scmp.ne.s32.totalorder %s67_s28, %s3709_s2  ;;  %p3715_p9 = scmp.lt.s32.totalorder %s3709_s2, %s3709_s2 }
  0x51   :  { %p3716_p10 = por %p3715_p9, %p3714_p8 }
  0x53   :  { %p3717_p11 = pnand %p3716_p10, %p3710_p7 }
  0x55   :  { %3720 = shalt.err (!%p3717_p11)
}
  0x56   :  { %72 = dma.hbm_to_vmem [thread:$0]  %s4064_s4, 36864, %s67_s28, [#allocation9], %s3801_s1, %s3801_s1, %s3802_s23  }
  0x57   :  { %s3721_s17 = scalar_lea.hbm %s4065_s5, 192 }
  0x58   :  { %p3722_p12 = scmp.ne.s32.totalorder %s4065_s5, %s3721_s17  ;;  %p3725_p13 = scmp.lt.u32.totalorder %s3721_s17, %s4065_s5 }
  0x5a   :  { %p3727_p0 = pnand %p3725_p13, %p3722_p12 }
  0x5c   :  { %3730 = shalt.err (!%p3727_p0)
}
  0x5d   :  { %s3731_s22 = scalar_lea.vmem %s80_s8, 192  ;;  %p3736_p2 = scmp.lt.s32.totalorder %s80_s8, %s80_s8 }
  0x5e   :  { %p3732_p1 = scmp.ne.s32.totalorder %s80_s8, %s3731_s22  ;;  %p3737_p3 = scmp.lt.s32.totalorder %s3731_s22, %s3731_s22 }
  0x60   :  { %p3738_p4 = por %p3737_p3, %p3736_p2 }
  0x62   :  { %p3739_p5 = pnand %p3738_p4, %p3732_p1 }
  0x64   :  { %3742 = shalt.err (!%p3739_p5)
}
  0x65   :  { %82 = dma.hbm_to_vmem [thread:$0]  %s4065_s5, 192, %s80_s8, [#allocation12]  }
  0x66   :  { %3787 = dma.done.wait [#allocation3], 128  }
  0x67   :  { %3788 = vsyncadd [#allocation3], 4294967168 }
  0x68   :  { %3789 = dma.done.wait [#allocation6], 768  }
  0x69   :  { %3790 = vsyncadd [#allocation6], 4294966528 }
  0x6a   :  { %3791 = dma.done.wait [#allocation9], 38400  }
  0x6b   :  { %3792 = vsyncadd [#allocation9], 4294928896 }
  0x6c   :  { %3793 = dma.done.wait [#allocation12], 192  }
  0x6d   :  { %3794 = vsyncadd [#allocation12], 4294967104  ;;  %v3807_v0 = vmov 0   ;;  %v3137_v1 = vld [vmem:[#allocation10 + $0x4] ss:$48 sps:$4 sm:$0xff]   ;;  %v105_v50 = vld [vmem:[#allocation5 + $0x8] sm:$0xff] }
  0x6e   :  { %1923 = vmatprep.mubr.bf16.mxu1 %v3807_v0  ;;  %v3139_v2 = vld [vmem:[#allocation10 + $0x604] ss:$48 sps:$4 sm:$0xff]   ;;  %1850 = vmatprep.subr.bf16.mxu0 %v3137_v1  ;;  %v3141_v3 = vld [vmem:[#allocation10] ss:$48 sps:$4 sm:$0xff]   ;;  %v3189_v35 = vld [vmem:[#allocation10 + $0xc] ss:$48 sps:$4 sm:$0xff]   ;;  %v3939_v53 = vpack.c.bf16 %v105_v50, %v105_v50 }
  0x6f   :  { %v3142_v4 = vld [vmem:[#allocation10 + $0x600] ss:$48 sps:$4 sm:$0xff]   ;;  %1891 = vmatprep.subr.bf16.mxu1 %v3139_v2  ;;  %v3143_v5 = vld [vmem:[#allocation10 + $0x64] ss:$48 sps:$4 sm:$0xff]   ;;  %1851 = vmatpush1.bf16.msra.mxu0 %v3141_v3  ;;  %v3187_v36 = vld [vmem:[#allocation10 + $0x8] ss:$48 sps:$4 sm:$0xff]  }
  0x70   :  { %1892 = vmatpush1.bf16.msra.mxu1 %v3142_v4  ;;  %v3145_v6 = vld [vmem:[#allocation10 + $0x664] ss:$48 sps:$4 sm:$0xff]   ;;  %v3147_v7 = vld [vmem:[#allocation10 + $0x60] ss:$48 sps:$4 sm:$0xff]   ;;  %1852 = vmatprep.subr.bf16.mxu0 %v3143_v5  ;;  %v3195_v40 = vld [vmem:[#allocation10 + $0x6c] ss:$48 sps:$4 sm:$0xff]  }
  0x71   :  { %v3148_v8 = vld [vmem:[#allocation10 + $0x660] ss:$48 sps:$4 sm:$0xff]   ;;  %1893 = vmatprep.subr.bf16.mxu1 %v3145_v6  ;;  %v3149_v9 = vld [vmem:[#allocation10 + $0xc4] ss:$48 sps:$4 sm:$0xff]   ;;  %v3193_v41 = vld [vmem:[#allocation10 + $0x68] ss:$48 sps:$4 sm:$0xff]   ;;  %1882 = vmatprep.mubr.bf16.mxu0 %v3939_v53 }
  0x72   :  { %v3151_v10 = vld [vmem:[#allocation10 + $0x6c4] ss:$48 sps:$4 sm:$0xff]   ;;  %v3153_v11 = vld [vmem:[#allocation10 + $0xc0] ss:$48 sps:$4 sm:$0xff]   ;;  %v3201_v44 = vld [vmem:[#allocation10 + $0xcc] ss:$48 sps:$4 sm:$0xff]  }
  0x73   :  { %v3154_v12 = vld [vmem:[#allocation10 + $0x6c0] ss:$48 sps:$4 sm:$0xff]   ;;  %1853 = vmatpush1.bf16.msra.mxu0 %v3147_v7  ;;  %v3155_v13 = vld [vmem:[#allocation10 + $0x124] ss:$48 sps:$4 sm:$0xff]   ;;  %v3199_v45 = vld [vmem:[#allocation10 + $0xc8] ss:$48 sps:$4 sm:$0xff]  }
  0x74   :  { %1894 = vmatpush1.bf16.msra.mxu1 %v3148_v8  ;;  %1854 = vmatprep.subr.bf16.mxu0 %v3149_v9  ;;  %v3157_v14 = vld [vmem:[#allocation10 + $0x724] ss:$48 sps:$4 sm:$0xff]   ;;  %v3159_v15 = vld [vmem:[#allocation10 + $0x120] ss:$48 sps:$4 sm:$0xff]   ;;  %v3207_v48 = vld [vmem:[#allocation10 + $0x12c] ss:$48 sps:$4 sm:$0xff]  }
  0x75   :  { %1895 = vmatprep.subr.bf16.mxu1 %v3151_v10  ;;  %v3160_v16 = vld [vmem:[#allocation10 + $0x720] ss:$48 sps:$4 sm:$0xff]   ;;  %v3161_v17 = vld [vmem:[#allocation10 + $0x184] ss:$48 sps:$4 sm:$0xff]   ;;  %v3205_v49 = vld [vmem:[#allocation10 + $0x128] ss:$48 sps:$4 sm:$0xff]  }
  0x76   :  { %v3163_v18 = vld [vmem:[#allocation10 + $0x784] ss:$48 sps:$4 sm:$0xff]   ;;  %v3165_v19 = vld [vmem:[#allocation10 + $0x180] ss:$48 sps:$4 sm:$0xff]   ;;  %v3213_v54 = vld [vmem:[#allocation10 + $0x18c] ss:$48 sps:$4 sm:$0xff]  }
  0x77   :  { %1855 = vmatpush1.bf16.msra.mxu0 %v3153_v11  ;;  %v3166_v20 = vld [vmem:[#allocation10 + $0x780] ss:$48 sps:$4 sm:$0xff]   ;;  %v3167_v21 = vld [vmem:[#allocation10 + $0x1e4] ss:$48 sps:$4 sm:$0xff]   ;;  %v3211_v55 = vld [vmem:[#allocation10 + $0x188] ss:$48 sps:$4 sm:$0xff]  }
  0x78   :  { %1896 = vmatpush1.bf16.msra.mxu1 %v3154_v12  ;;  %1856 = vmatprep.subr.bf16.mxu0 %v3155_v13  ;;  %v3169_v22 = vld [vmem:[#allocation10 + $0x7e4] ss:$48 sps:$4 sm:$0xff]   ;;  %v3171_v23 = vld [vmem:[#allocation10 + $0x1e0] ss:$48 sps:$4 sm:$0xff]   ;;  %v3219_v58 = vld [vmem:[#allocation10 + $0x1ec] ss:$48 sps:$4 sm:$0xff]  }
  0x79   :  { %1897 = vmatprep.subr.bf16.mxu1 %v3157_v14  ;;  %v3172_v24 = vld [vmem:[#allocation10 + $0x7e0] ss:$48 sps:$4 sm:$0xff]   ;;  %v3173_v25 = vld [vmem:[#allocation10 + $0x244] ss:$48 sps:$4 sm:$0xff]   ;;  %v3217_v59 = vld [vmem:[#allocation10 + $0x1e8] ss:$48 sps:$4 sm:$0xff]  }
  0x7a   :  { %v3175_v26 = vld [vmem:[#allocation10 + $0x844] ss:$48 sps:$4 sm:$0xff]   ;;  %v3177_v27 = vld [vmem:[#allocation10 + $0x240] ss:$48 sps:$4 sm:$0xff]   ;;  %v3225_v62 = vld [vmem:[#allocation10 + $0x24c] ss:$48 sps:$4 sm:$0xff]  }
  0x7b   :  { %1857 = vmatpush1.bf16.msra.mxu0 %v3159_v15  ;;  %v3178_v28 = vld [vmem:[#allocation10 + $0x840] ss:$48 sps:$4 sm:$0xff]   ;;  %v3179_v29 = vld [vmem:[#allocation10 + $0x2a4] ss:$48 sps:$4 sm:$0xff]   ;;  %v3223_v63 = vld [vmem:[#allocation10 + $0x248] ss:$48 sps:$4 sm:$0xff]  }
  0x7c   :  { %1898 = vmatpush1.bf16.msra.mxu1 %v3160_v16  ;;  %1858 = vmatprep.subr.bf16.mxu0 %v3161_v17  ;;  %v3181_v30 = vld [vmem:[#allocation10 + $0x8a4] ss:$48 sps:$4 sm:$0xff]   ;;  %v3183_v31 = vld [vmem:[#allocation10 + $0x2a0] ss:$48 sps:$4 sm:$0xff]   ;;  %v3231_v3 = vld [vmem:[#allocation10 + $0x2ac] ss:$48 sps:$4 sm:$0xff]  }
  0x7d   :  { %1899 = vmatprep.subr.bf16.mxu1 %v3163_v18  ;;  %v3184_v32 = vld [vmem:[#allocation10 + $0x8a0] ss:$48 sps:$4 sm:$0xff]   ;;  %v3185_v34 = vld [vmem:[#allocation10 + $0x304] ss:$48 sps:$4 sm:$0xff]   ;;  %v3229_v4 = vld [vmem:[#allocation10 + $0x2a8] ss:$48 sps:$4 sm:$0xff]  }
  0x7e   :  { %v106_v33 = vld [vmem:[#allocation5 + $0x10] sm:$0xff]  ;;  %v104_v6 = vld [vmem:[#allocation5] sm:$0xff]  ;;  %v3235_v7 = vld [vmem:[#allocation10 + $0x30c] ss:$48 sps:$4 sm:$0xff]   ;;  %vm2402_vm0 = vcmask 130048   ;;  %s3808_s5 = smov [#allocation14]  }
  0x7f   :  { %1859 = vmatpush1.bf16.msra.mxu0 %v3165_v19  ;;  %v3190_v37 = vld [vmem:[#allocation10 + $0x300] ss:$48 sps:$4 sm:$0xff]   ;;  %v3936_v38 = vpack.c.bf16 %v106_v33, %v106_v33  ;;  %v3191_v39 = vld [vmem:[#allocation10 + $0x364] ss:$48 sps:$4 sm:$0xff]   ;;  %v3238_v8 = vld [vmem:[#allocation10 + $0x60c] ss:$48 sps:$4 sm:$0xff]   ;;  %v3943_v9 = vpack.c.bf16 %v104_v6, %v104_v6 }
  0x80   :  { %1900 = vmatpush1.bf16.msra.mxu1 %v3166_v20  ;;  %1860 = vmatprep.subr.bf16.mxu0 %v3167_v21  ;;  %v3196_v42 = vld [vmem:[#allocation10 + $0x360] ss:$48 sps:$4 sm:$0xff]   ;;  %v3197_v43 = vld [vmem:[#allocation10 + $0x3c4] ss:$48 sps:$4 sm:$0xff]   ;;  %v3233_v10 = vld [vmem:[#allocation10 + $0x308] ss:$48 sps:$4 sm:$0xff]  }
  0x81   :  { %1901 = vmatprep.subr.bf16.mxu1 %v3169_v22  ;;  %v3202_v46 = vld [vmem:[#allocation10 + $0x3c0] ss:$48 sps:$4 sm:$0xff]   ;;  %v3203_v47 = vld [vmem:[#allocation10 + $0x424] ss:$48 sps:$4 sm:$0xff]   ;;  %v3236_v11 = vld [vmem:[#allocation10 + $0x608] ss:$48 sps:$4 sm:$0xff]  }
  0x82   :  { %v3208_v51 = vld [vmem:[#allocation10 + $0x420] ss:$48 sps:$4 sm:$0xff]   ;;  %v3209_v52 = vld [vmem:[#allocation10 + $0x484] ss:$48 sps:$4 sm:$0xff]   ;;  %v3241_v12 = vld [vmem:[#allocation10 + $0x36c] ss:$48 sps:$4 sm:$0xff]  }
  0x83   :  { %1861 = vmatpush1.bf16.msra.mxu0 %v3171_v23  ;;  %v3214_v56 = vld [vmem:[#allocation10 + $0x480] ss:$48 sps:$4 sm:$0xff]   ;;  %v3215_v57 = vld [vmem:[#allocation10 + $0x4e4] ss:$48 sps:$4 sm:$0xff]   ;;  %v3244_v13 = vld [vmem:[#allocation10 + $0x66c] ss:$48 sps:$4 sm:$0xff]  }
  0x84   :  { %1902 = vmatpush1.bf16.msra.mxu1 %v3172_v24  ;;  %1862 = vmatprep.subr.bf16.mxu0 %v3173_v25  ;;  %v3220_v60 = vld [vmem:[#allocation10 + $0x4e0] ss:$48 sps:$4 sm:$0xff]   ;;  %v3221_v61 = vld [vmem:[#allocation10 + $0x544] ss:$48 sps:$4 sm:$0xff]   ;;  %v3239_v14 = vld [vmem:[#allocation10 + $0x368] ss:$48 sps:$4 sm:$0xff]  }
  0x85   :  { %1903 = vmatprep.subr.bf16.mxu1 %v3175_v26  ;;  %v3226_v1 = vld [vmem:[#allocation10 + $0x540] ss:$48 sps:$4 sm:$0xff]   ;;  %v3227_v2 = vld [vmem:[#allocation10 + $0x5a4] ss:$48 sps:$4 sm:$0xff]   ;;  %v3242_v15 = vld [vmem:[#allocation10 + $0x668] ss:$48 sps:$4 sm:$0xff]  }
  0x86   :  { %v3232_v5 = vld [vmem:[#allocation10 + $0x5a0] ss:$48 sps:$4 sm:$0xff]   ;;  %v3247_v16 = vld [vmem:[#allocation10 + $0x3cc] ss:$48 sps:$4 sm:$0xff]   ;;  %v3245_v18 = vld [vmem:[#allocation10 + $0x3c8] ss:$48 sps:$4 sm:$0xff]  }
  0x87   :  { %1863 = vmatpush1.bf16.msra.mxu0 %v3177_v27  ;;  %v3250_v17 = vld [vmem:[#allocation10 + $0x6cc] ss:$48 sps:$4 sm:$0xff]   ;;  %v3248_v19 = vld [vmem:[#allocation10 + $0x6c8] ss:$48 sps:$4 sm:$0xff]   ;;  %v3298_v50 = vld [vmem:[#allocation10 + $0x6d4] ss:$48 sps:$4 sm:$0xff]  }
  0x88   :  { %1904 = vmatpush1.bf16.msra.mxu1 %v3178_v28  ;;  %1864 = vmatprep.subr.bf16.mxu0 %v3179_v29  ;;  %v3253_v20 = vld [vmem:[#allocation10 + $0x42c] ss:$48 sps:$4 sm:$0xff]   ;;  %v3251_v22 = vld [vmem:[#allocation10 + $0x428] ss:$48 sps:$4 sm:$0xff]   ;;  %v3320_v6 = vld [vmem:[#allocation10 + $0x850] ss:$48 sps:$4 sm:$0xff]  }
  0x89   :  { %1905 = vmatprep.subr.bf16.mxu1 %v3181_v30  ;;  %v3256_v21 = vld [vmem:[#allocation10 + $0x72c] ss:$48 sps:$4 sm:$0xff]   ;;  %v3254_v23 = vld [vmem:[#allocation10 + $0x728] ss:$48 sps:$4 sm:$0xff]   ;;  %s2804_s23 = sshll.u32 %s3808_s5, 4  ;;  %s2805_s23 = int_to_ptr.vmem [resolvable:$true] %s2804_s23 }
  0x8a   :  { %v3259_v24 = vld [vmem:[#allocation10 + $0x48c] ss:$48 sps:$4 sm:$0xff]   ;;  %v3257_v26 = vld [vmem:[#allocation10 + $0x488] ss:$48 sps:$4 sm:$0xff]   ;;  %s3743_s24 = scalar_lea.vmem %s2805_s23, 384  ;;  %p3748_p7 = scmp.lt.s32.totalorder %s2805_s23, %s2805_s23 }
  0x8b   :  { %1865 = vmatpush1.bf16.msra.mxu0 %v3183_v31  ;;  %v3262_v25 = vld [vmem:[#allocation10 + $0x78c] ss:$48 sps:$4 sm:$0xff]   ;;  %v3260_v27 = vld [vmem:[#allocation10 + $0x788] ss:$48 sps:$4 sm:$0xff]   ;;  %p3744_p6 = scmp.ne.s32.totalorder %s2805_s23, %s3743_s24  ;;  %p3749_p8 = scmp.lt.s32.totalorder %s3743_s24, %s3743_s24 }
  0x8c   :  { %1906 = vmatpush1.bf16.msra.mxu1 %v3184_v32  ;;  %1866 = vmatprep.subr.bf16.mxu0 %v3185_v34  ;;  %v3265_v28 = vld [vmem:[#allocation10 + $0x4ec] ss:$48 sps:$4 sm:$0xff]   ;;  %v3263_v30 = vld [vmem:[#allocation10 + $0x4e8] ss:$48 sps:$4 sm:$0xff]  }
  0x8d   :  { %1932 = vmatprep.subr.bf16.mxu1 %v3189_v35  ;;  %v3268_v29 = vld [vmem:[#allocation10 + $0x7ec] ss:$48 sps:$4 sm:$0xff]   ;;  %v3266_v31 = vld [vmem:[#allocation10 + $0x7e8] ss:$48 sps:$4 sm:$0xff]   ;;  %p3750_p9 = por %p3749_p8, %p3748_p7 }
  0x8e   :  { %v3271_v32 = vld [vmem:[#allocation10 + $0x54c] ss:$48 sps:$4 sm:$0xff]   ;;  %v3269_v34 = vld [vmem:[#allocation10 + $0x548] ss:$48 sps:$4 sm:$0xff]  }
  0x8f   :  { %1924 = vmatmul.mubr.bf16.vlgmr.msra.gmra.mrb[0].mxu1 %v3936_v38  ;;  %1867 = vmatpush1.bf16.msra.mxu0 %v3190_v37  ;;  %v3274_v33 = vld [vmem:[#allocation10 + $0x84c] ss:$48 sps:$4 sm:$0xff]   ;;  %v3272_v35 = vld [vmem:[#allocation10 + $0x848] ss:$48 sps:$4 sm:$0xff]   ;;  %p3751_p10 = pnand %p3750_p9, %p3744_p6 }
  0x90   :  { %1933 = vmatpush1.bf16.msra.mxu1 %v3187_v36  ;;  %1868 = vmatprep.subr.bf16.mxu0 %v3191_v39  ;;  %v3277_v36 = vld [vmem:[#allocation10 + $0x5ac] ss:$48 sps:$4 sm:$0xff]   ;;  %v3275_v39 = vld [vmem:[#allocation10 + $0x5a8] ss:$48 sps:$4 sm:$0xff]  }
  0x91   :  { %1934 = vmatprep.subr.bf16.mxu1 %v3195_v40  ;;  %1964 = vmatprep.mubr.bf16.mxu1 %v3939_v53  ;;  %v3280_v37 = vld [vmem:[#allocation10 + $0x8ac] ss:$48 sps:$4 sm:$0xff]   ;;  %v3278_v40 = vld [vmem:[#allocation10 + $0x8a8] ss:$48 sps:$4 sm:$0xff]  }
  0x93   :  { %1869 = vmatpush1.bf16.msra.mxu0 %v3196_v42  ;;  %v3286_v42 = vld [vmem:[#allocation10 + $0x614] ss:$48 sps:$4 sm:$0xff]  }
  0x94   :  { %1935 = vmatpush1.bf16.msra.mxu1 %v3193_v41  ;;  %1870 = vmatprep.subr.bf16.mxu0 %v3197_v43  ;;  %v3283_v41 = vld [vmem:[#allocation10 + $0x14] ss:$48 sps:$4 sm:$0xff]   ;;  %v3281_v43 = vld [vmem:[#allocation10 + $0x10] ss:$48 sps:$4 sm:$0xff]  }
  0x95   :  { %1936 = vmatprep.subr.bf16.mxu1 %v3201_v44  ;;  %v3284_v44 = vld [vmem:[#allocation10 + $0x610] ss:$48 sps:$4 sm:$0xff]  }
  0x97   :  { %1871 = vmatpush1.bf16.msra.mxu0 %v3202_v46  ;;  %v3292_v46 = vld [vmem:[#allocation10 + $0x674] ss:$48 sps:$4 sm:$0xff]  }
  0x98   :  { %1937 = vmatpush1.bf16.msra.mxu1 %v3199_v45  ;;  %1872 = vmatprep.subr.bf16.mxu0 %v3203_v47  ;;  %v3289_v45 = vld [vmem:[#allocation10 + $0x74] ss:$48 sps:$4 sm:$0xff]   ;;  %v3287_v47 = vld [vmem:[#allocation10 + $0x70] ss:$48 sps:$4 sm:$0xff]  }
  0x99   :  { %1938 = vmatprep.subr.bf16.mxu1 %v3207_v48  ;;  %v3290_v48 = vld [vmem:[#allocation10 + $0x670] ss:$48 sps:$4 sm:$0xff]  }
  0x9b   :  { %1873 = vmatpush1.bf16.msra.mxu0 %v3208_v51  ;;  %v3293_v51 = vld [vmem:[#allocation10 + $0xd0] ss:$48 sps:$4 sm:$0xff]  }
  0x9c   :  { %1939 = vmatpush1.bf16.msra.mxu1 %v3205_v49  ;;  %1874 = vmatprep.subr.bf16.mxu0 %v3209_v52  ;;  %v3295_v49 = vld [vmem:[#allocation10 + $0xd4] ss:$48 sps:$4 sm:$0xff]   ;;  %v3296_v52 = vld [vmem:[#allocation10 + $0x6d0] ss:$48 sps:$4 sm:$0xff]  }
  0x9d   :  { %1940 = vmatprep.subr.bf16.mxu1 %v3213_v54  ;;  %v3301_v54 = vld [vmem:[#allocation10 + $0x134] ss:$48 sps:$4 sm:$0xff]  }
  0x9f   :  { %1875 = vmatpush1.bf16.msra.mxu0 %v3214_v56  ;;  %v3299_v56 = vld [vmem:[#allocation10 + $0x130] ss:$48 sps:$4 sm:$0xff]  }
  0xa0   :  { %1941 = vmatpush1.bf16.msra.mxu1 %v3211_v55  ;;  %1876 = vmatprep.subr.bf16.mxu0 %v3215_v57  ;;  %v3304_v55 = vld [vmem:[#allocation10 + $0x734] ss:$48 sps:$4 sm:$0xff]   ;;  %v3302_v57 = vld [vmem:[#allocation10 + $0x730] ss:$48 sps:$4 sm:$0xff]  }
  0xa1   :  { %1942 = vmatprep.subr.bf16.mxu1 %v3219_v58  ;;  %v3307_v58 = vld [vmem:[#allocation10 + $0x194] ss:$48 sps:$4 sm:$0xff]  }
  0xa3   :  { %1877 = vmatpush1.bf16.msra.mxu0 %v3220_v60  ;;  %v3305_v60 = vld [vmem:[#allocation10 + $0x190] ss:$48 sps:$4 sm:$0xff]  }
  0xa4   :  { %1943 = vmatpush1.bf16.msra.mxu1 %v3217_v59  ;;  %1878 = vmatprep.subr.bf16.mxu0 %v3221_v61  ;;  %v3310_v59 = vld [vmem:[#allocation10 + $0x794] ss:$48 sps:$4 sm:$0xff]   ;;  %v3308_v61 = vld [vmem:[#allocation10 + $0x790] ss:$48 sps:$4 sm:$0xff]  }
  0xa5   :  { %1944 = vmatprep.subr.bf16.mxu1 %v3225_v62  ;;  %v3313_v62 = vld [vmem:[#allocation10 + $0x1f4] ss:$48 sps:$4 sm:$0xff]  }
  0xa7   :  { %1879 = vmatpush1.bf16.msra.mxu0 %v3226_v1  ;;  %v3311_v1 = vld [vmem:[#allocation10 + $0x1f0] ss:$48 sps:$4 sm:$0xff]  }
  0xa8   :  { %1945 = vmatpush1.bf16.msra.mxu1 %v3223_v63  ;;  %1880 = vmatprep.subr.bf16.mxu0 %v3227_v2  ;;  %v3316_v63 = vld [vmem:[#allocation10 + $0x7f4] ss:$48 sps:$4 sm:$0xff]   ;;  %v3314_v2 = vld [vmem:[#allocation10 + $0x7f0] ss:$48 sps:$4 sm:$0xff]  }
  0xa9   :  { %1946 = vmatprep.subr.bf16.mxu1 %v3231_v3  ;;  %v3319_v3 = vld [vmem:[#allocation10 + $0x254] ss:$48 sps:$4 sm:$0xff]  }
  0xab   :  { %1881 = vmatpush1.bf16.msra.mxu0 %v3232_v5  ;;  %v3317_v5 = vld [vmem:[#allocation10 + $0x250] ss:$48 sps:$4 sm:$0xff]  }
  0xac   :  { %1947 = vmatpush1.bf16.msra.mxu1 %v3229_v4  ;;  %1973 = vmatprep.subr.bf16.mxu0 %v3238_v8  ;;  %v3322_v4 = vld [vmem:[#allocation10 + $0x854] ss:$48 sps:$4 sm:$0xff]  }
  0xad   :  { %1948 = vmatprep.subr.bf16.mxu1 %v3235_v7  ;;  %v3325_v7 = vld [vmem:[#allocation10 + $0x2b4] ss:$48 sps:$4 sm:$0xff]  }
  0xae   :  { %1883 = vmatmul.mubr.bf16.vlgmr.msra.gmra.mrb[0].mxu0 %v3943_v9  ;;  %v3328_v8 = vld [vmem:[#allocation10 + $0x8b4] ss:$48 sps:$4 sm:$0xff]  }
  0xaf   :  { %1974 = vmatpush1.bf16.msra.mxu0 %v3236_v11  ;;  %2005 = vmatprep.mubr.bf16.mxu0 %v3807_v0  ;;  %v3326_v11 = vld [vmem:[#allocation10 + $0x8b0] ss:$48 sps:$4 sm:$0xff]  }
  0xb0   :  { %1949 = vmatpush1.bf16.msra.mxu1 %v3233_v10  ;;  %1975 = vmatprep.subr.bf16.mxu0 %v3244_v13  ;;  %v3323_v10 = vld [vmem:[#allocation10 + $0x2b0] ss:$48 sps:$4 sm:$0xff]   ;;  %v3334_v13 = vld [vmem:[#allocation10 + $0x1c] ss:$48 sps:$4 sm:$0xff]  }
  0xb1   :  { %1950 = vmatprep.subr.bf16.mxu1 %v3241_v12  ;;  %v3331_v12 = vld [vmem:[#allocation10 + $0x314] ss:$48 sps:$4 sm:$0xff]  }
  0xb3   :  { %1976 = vmatpush1.bf16.msra.mxu0 %v3242_v15  ;;  %v3332_v15 = vld [vmem:[#allocation10 + $0x18] ss:$48 sps:$4 sm:$0xff]  }
  0xb4   :  { %1951 = vmatpush1.bf16.msra.mxu1 %v3239_v14  ;;  %1977 = vmatprep.subr.bf16.mxu0 %v3250_v17  ;;  %v3329_v14 = vld [vmem:[#allocation10 + $0x310] ss:$48 sps:$4 sm:$0xff]   ;;  %v3340_v17 = vld [vmem:[#allocation10 + $0x7c] ss:$48 sps:$4 sm:$0xff]  }
  0xb5   :  { %1952 = vmatprep.subr.bf16.mxu1 %v3247_v16  ;;  %v3337_v16 = vld [vmem:[#allocation10 + $0x374] ss:$48 sps:$4 sm:$0xff]  }
  0xb7   :  { %1978 = vmatpush1.bf16.msra.mxu0 %v3248_v19  ;;  %v3338_v19 = vld [vmem:[#allocation10 + $0x78] ss:$48 sps:$4 sm:$0xff]  }
  0xb8   :  { %1953 = vmatpush1.bf16.msra.mxu1 %v3245_v18  ;;  %1979 = vmatprep.subr.bf16.mxu0 %v3256_v21  ;;  %v3335_v18 = vld [vmem:[#allocation10 + $0x370] ss:$48 sps:$4 sm:$0xff]   ;;  %v3346_v21 = vld [vmem:[#allocation10 + $0xdc] ss:$48 sps:$4 sm:$0xff]  }
  0xb9   :  { %1954 = vmatprep.subr.bf16.mxu1 %v3253_v20  ;;  %v3343_v20 = vld [vmem:[#allocation10 + $0x3d4] ss:$48 sps:$4 sm:$0xff]  }
  0xbb   :  { %1980 = vmatpush1.bf16.msra.mxu0 %v3254_v23  ;;  %v3344_v23 = vld [vmem:[#allocation10 + $0xd8] ss:$48 sps:$4 sm:$0xff]  }
  0xbc   :  { %1955 = vmatpush1.bf16.msra.mxu1 %v3251_v22  ;;  %1981 = vmatprep.subr.bf16.mxu0 %v3262_v25  ;;  %v3341_v22 = vld [vmem:[#allocation10 + $0x3d0] ss:$48 sps:$4 sm:$0xff]   ;;  %v3352_v25 = vld [vmem:[#allocation10 + $0x13c] ss:$48 sps:$4 sm:$0xff]  }
  0xbd   :  { %1956 = vmatprep.subr.bf16.mxu1 %v3259_v24  ;;  %v3349_v24 = vld [vmem:[#allocation10 + $0x434] ss:$48 sps:$4 sm:$0xff]  }
  0xbf   :  { %1982 = vmatpush1.bf16.msra.mxu0 %v3260_v27  ;;  %v3350_v27 = vld [vmem:[#allocation10 + $0x138] ss:$48 sps:$4 sm:$0xff]  }
  0xc0   :  { %1957 = vmatpush1.bf16.msra.mxu1 %v3257_v26  ;;  %1983 = vmatprep.subr.bf16.mxu0 %v3268_v29  ;;  %v3347_v26 = vld [vmem:[#allocation10 + $0x430] ss:$48 sps:$4 sm:$0xff]   ;;  %v3358_v29 = vld [vmem:[#allocation10 + $0x19c] ss:$48 sps:$4 sm:$0xff]  }
  0xc1   :  { %1958 = vmatprep.subr.bf16.mxu1 %v3265_v28  ;;  %v3355_v28 = vld [vmem:[#allocation10 + $0x494] ss:$48 sps:$4 sm:$0xff]  }
  0xc3   :  { %1984 = vmatpush1.bf16.msra.mxu0 %v3266_v31  ;;  %v3356_v31 = vld [vmem:[#allocation10 + $0x198] ss:$48 sps:$4 sm:$0xff]  }
  0xc4   :  { %1959 = vmatpush1.bf16.msra.mxu1 %v3263_v30  ;;  %1985 = vmatprep.subr.bf16.mxu0 %v3274_v33  ;;  %v3353_v30 = vld [vmem:[#allocation10 + $0x490] ss:$48 sps:$4 sm:$0xff]   ;;  %v3364_v33 = vld [vmem:[#allocation10 + $0x1fc] ss:$48 sps:$4 sm:$0xff]  }
  0xc5   :  { %1960 = vmatprep.subr.bf16.mxu1 %v3271_v32  ;;  %v3361_v32 = vld [vmem:[#allocation10 + $0x4f4] ss:$48 sps:$4 sm:$0xff]  }
  0xc7   :  { %1986 = vmatpush1.bf16.msra.mxu0 %v3272_v35  ;;  %v3362_v35 = vld [vmem:[#allocation10 + $0x1f8] ss:$48 sps:$4 sm:$0xff]  }
  0xc8   :  { %1961 = vmatpush1.bf16.msra.mxu1 %v3269_v34  ;;  %1987 = vmatprep.subr.bf16.mxu0 %v3280_v37  ;;  %v3359_v34 = vld [vmem:[#allocation10 + $0x4f0] ss:$48 sps:$4 sm:$0xff]   ;;  %v3370_v37 = vld [vmem:[#allocation10 + $0x25c] ss:$48 sps:$4 sm:$0xff]  }
  0xc9   :  { %1962 = vmatprep.subr.bf16.mxu1 %v3277_v36  ;;  %v3367_v36 = vld [vmem:[#allocation10 + $0x554] ss:$48 sps:$4 sm:$0xff]  }
  0xcb   :  { %1988 = vmatpush1.bf16.msra.mxu0 %v3278_v40  ;;  %v3368_v40 = vld [vmem:[#allocation10 + $0x258] ss:$48 sps:$4 sm:$0xff]  }
  0xcc   :  { %1963 = vmatpush1.bf16.msra.mxu1 %v3275_v39  ;;  %2014 = vmatprep.subr.bf16.mxu0 %v3283_v41  ;;  %v3365_v39 = vld [vmem:[#allocation10 + $0x550] ss:$48 sps:$4 sm:$0xff]   ;;  %v3373_v41 = vld [vmem:[#allocation10 + $0x5b4] ss:$48 sps:$4 sm:$0xff]  }
  0xcd   :  { %2055 = vmatprep.subr.bf16.mxu1 %v3286_v42  ;;  %v3376_v42 = vld [vmem:[#allocation10 + $0x2bc] ss:$48 sps:$4 sm:$0xff]  }
  0xce   :  { %2006 = vmatmul.mubr.bf16.vlgmr.msra.gmra.mrb[4].mxu0 %v3936_v38 }
  0xcf   :  { %1965 = vmatmul.mubr.bf16.vlgmr.msra.gmra.mrb[4].mxu1 %v3943_v9  ;;  %2015 = vmatpush1.bf16.msra.mxu0 %v3281_v43  ;;  %v3371_v43 = vld [vmem:[#allocation10 + $0x5b0] ss:$48 sps:$4 sm:$0xff]  }
  0xd0   :  { %2056 = vmatpush1.bf16.msra.mxu1 %v3284_v44  ;;  %2016 = vmatprep.subr.bf16.mxu0 %v3289_v45  ;;  %v3374_v44 = vld [vmem:[#allocation10 + $0x2b8] ss:$48 sps:$4 sm:$0xff]   ;;  %v3379_v45 = vld [vmem:[#allocation10 + $0x31c] ss:$48 sps:$4 sm:$0xff]  }
  0xd1   :  { %2057 = vmatprep.subr.bf16.mxu1 %v3292_v46  ;;  %2087 = vmatprep.mubr.bf16.mxu1 %v3807_v0  ;;  %v3382_v46 = vld [vmem:[#allocation10 + $0x61c] ss:$48 sps:$4 sm:$0xff]  }
  0xd2   :  { %2046 = vmatprep.mubr.bf16.mxu0 %v3939_v53 }
  0xd3   :  { %2017 = vmatpush1.bf16.msra.mxu0 %v3287_v47  ;;  %v3377_v47 = vld [vmem:[#allocation10 + $0x318] ss:$48 sps:$4 sm:$0xff]  }
  0xd4   :  { %2058 = vmatpush1.bf16.msra.mxu1 %v3290_v48  ;;  %2018 = vmatprep.subr.bf16.mxu0 %v3295_v49  ;;  %v3380_v48 = vld [vmem:[#allocation10 + $0x618] ss:$48 sps:$4 sm:$0xff]   ;;  %v3385_v49 = vld [vmem:[#allocation10 + $0x37c] ss:$48 sps:$4 sm:$0xff]  }
  0xd5   :  { %2059 = vmatprep.subr.bf16.mxu1 %v3298_v50  ;;  %v3388_v50 = vld [vmem:[#allocation10 + $0x67c] ss:$48 sps:$4 sm:$0xff]  }
  0xd7   :  { %2019 = vmatpush1.bf16.msra.mxu0 %v3293_v51  ;;  %v3383_v51 = vld [vmem:[#allocation10 + $0x378] ss:$48 sps:$4 sm:$0xff]  }
  0xd8   :  { %2060 = vmatpush1.bf16.msra.mxu1 %v3296_v52  ;;  %2020 = vmatprep.subr.bf16.mxu0 %v3301_v54  ;;  %v3386_v52 = vld [vmem:[#allocation10 + $0x678] ss:$48 sps:$4 sm:$0xff]   ;;  %v3391_v54 = vld [vmem:[#allocation10 + $0x3dc] ss:$48 sps:$4 sm:$0xff]  }
  0xd9   :  { %2061 = vmatprep.subr.bf16.mxu1 %v3304_v55  ;;  %v3394_v55 = vld [vmem:[#allocation10 + $0x6dc] ss:$48 sps:$4 sm:$0xff]  }
  0xdb   :  { %2021 = vmatpush1.bf16.msra.mxu0 %v3299_v56  ;;  %v3389_v56 = vld [vmem:[#allocation10 + $0x3d8] ss:$48 sps:$4 sm:$0xff]  }
  0xdc   :  { %2062 = vmatpush1.bf16.msra.mxu1 %v3302_v57  ;;  %2022 = vmatprep.subr.bf16.mxu0 %v3307_v58  ;;  %v3392_v57 = vld [vmem:[#allocation10 + $0x6d8] ss:$48 sps:$4 sm:$0xff]   ;;  %v3397_v58 = vld [vmem:[#allocation10 + $0x43c] ss:$48 sps:$4 sm:$0xff]  }
  0xdd   :  { %2063 = vmatprep.subr.bf16.mxu1 %v3310_v59  ;;  %v3400_v59 = vld [vmem:[#allocation10 + $0x73c] ss:$48 sps:$4 sm:$0xff]  }
  0xdf   :  { %2023 = vmatpush1.bf16.msra.mxu0 %v3305_v60  ;;  %v3395_v60 = vld [vmem:[#allocation10 + $0x438] ss:$48 sps:$4 sm:$0xff]  }
  0xe0   :  { %2064 = vmatpush1.bf16.msra.mxu1 %v3308_v61  ;;  %2024 = vmatprep.subr.bf16.mxu0 %v3313_v62  ;;  %v3398_v61 = vld [vmem:[#allocation10 + $0x738] ss:$48 sps:$4 sm:$0xff]   ;;  %v3403_v62 = vld [vmem:[#allocation10 + $0x49c] ss:$48 sps:$4 sm:$0xff]  }
  0xe1   :  { %2065 = vmatprep.subr.bf16.mxu1 %v3316_v63  ;;  %v3406_v63 = vld [vmem:[#allocation10 + $0x79c] ss:$48 sps:$4 sm:$0xff]  }
  0xe3   :  { %2025 = vmatpush1.bf16.msra.mxu0 %v3311_v1  ;;  %v3401_v1 = vld [vmem:[#allocation10 + $0x498] ss:$48 sps:$4 sm:$0xff]  }
  0xe4   :  { %2066 = vmatpush1.bf16.msra.mxu1 %v3314_v2  ;;  %2026 = vmatprep.subr.bf16.mxu0 %v3319_v3  ;;  %v3404_v2 = vld [vmem:[#allocation10 + $0x798] ss:$48 sps:$4 sm:$0xff]   ;;  %v3409_v3 = vld [vmem:[#allocation10 + $0x4fc] ss:$48 sps:$4 sm:$0xff]  }
  0xe5   :  { %2067 = vmatprep.subr.bf16.mxu1 %v3322_v4  ;;  %v3412_v4 = vld [vmem:[#allocation10 + $0x7fc] ss:$48 sps:$4 sm:$0xff]  }
  0xe7   :  { %2027 = vmatpush1.bf16.msra.mxu0 %v3317_v5  ;;  %v3407_v5 = vld [vmem:[#allocation10 + $0x4f8] ss:$48 sps:$4 sm:$0xff]  }
  0xe8   :  { %2068 = vmatpush1.bf16.msra.mxu1 %v3320_v6  ;;  %2028 = vmatprep.subr.bf16.mxu0 %v3325_v7  ;;  %v3410_v6 = vld [vmem:[#allocation10 + $0x7f8] ss:$48 sps:$4 sm:$0xff]   ;;  %v3415_v7 = vld [vmem:[#allocation10 + $0x55c] ss:$48 sps:$4 sm:$0xff]  }
  0xe9   :  { %2069 = vmatprep.subr.bf16.mxu1 %v3328_v8  ;;  %v3418_v8 = vld [vmem:[#allocation10 + $0x85c] ss:$48 sps:$4 sm:$0xff]  }
  0xeb   :  { %2029 = vmatpush1.bf16.msra.mxu0 %v3323_v10  ;;  %v3413_v10 = vld [vmem:[#allocation10 + $0x558] ss:$48 sps:$4 sm:$0xff]  }
  0xec   :  { %2070 = vmatpush1.bf16.msra.mxu1 %v3326_v11  ;;  %2030 = vmatprep.subr.bf16.mxu0 %v3331_v12  ;;  %v3416_v11 = vld [vmem:[#allocation10 + $0x858] ss:$48 sps:$4 sm:$0xff]   ;;  %v3421_v12 = vld [vmem:[#allocation10 + $0x5bc] ss:$48 sps:$4 sm:$0xff]  }
  0xed   :  { %2096 = vmatprep.subr.bf16.mxu1 %v3334_v13  ;;  %v3424_v13 = vld [vmem:[#allocation10 + $0x8bc] ss:$48 sps:$4 sm:$0xff]  }
  0xef   :  { %2088 = vmatmul.mubr.bf16.vlgmr.msra.gmra.mrb[8].mxu1 %v3936_v38  ;;  %2031 = vmatpush1.bf16.msra.mxu0 %v3329_v14  ;;  %v3419_v14 = vld [vmem:[#allocation10 + $0x5b8] ss:$48 sps:$4 sm:$0xff]  }
  0xf0   :  { %2097 = vmatpush1.bf16.msra.mxu1 %v3332_v15  ;;  %2032 = vmatprep.subr.bf16.mxu0 %v3337_v16  ;;  %v3422_v15 = vld [vmem:[#allocation10 + $0x8b8] ss:$48 sps:$4 sm:$0xff]   ;;  %v3427_v16 = vld [vmem:[#allocation10 + $0x24] ss:$48 sps:$4 sm:$0xff]  }
  0xf1   :  { %2098 = vmatprep.subr.bf16.mxu1 %v3340_v17  ;;  %2128 = vmatprep.mubr.bf16.mxu1 %v3939_v53  ;;  %v3430_v17 = vld [vmem:[#allocation10 + $0x624] ss:$48 sps:$4 sm:$0xff]  }
  0xf3   :  { %2033 = vmatpush1.bf16.msra.mxu0 %v3335_v18  ;;  %v3425_v18 = vld [vmem:[#allocation10 + $0x20] ss:$48 sps:$4 sm:$0xff]  }
  0xf4   :  { %2099 = vmatpush1.bf16.msra.mxu1 %v3338_v19  ;;  %2034 = vmatprep.subr.bf16.mxu0 %v3343_v20  ;;  %v3428_v19 = vld [vmem:[#allocation10 + $0x620] ss:$48 sps:$4 sm:$0xff]   ;;  %v3433_v20 = vld [vmem:[#allocation10 + $0x84] ss:$48 sps:$4 sm:$0xff]  }
  0xf5   :  { %2100 = vmatprep.subr.bf16.mxu1 %v3346_v21  ;;  %v3436_v21 = vld [vmem:[#allocation10 + $0x684] ss:$48 sps:$4 sm:$0xff]  }
  0xf7   :  { %2035 = vmatpush1.bf16.msra.mxu0 %v3341_v22  ;;  %v3431_v22 = vld [vmem:[#allocation10 + $0x80] ss:$48 sps:$4 sm:$0xff]  }
  0xf8   :  { %2101 = vmatpush1.bf16.msra.mxu1 %v3344_v23  ;;  %2036 = vmatprep.subr.bf16.mxu0 %v3349_v24  ;;  %v3434_v23 = vld [vmem:[#allocation10 + $0x680] ss:$48 sps:$4 sm:$0xff]   ;;  %v3439_v24 = vld [vmem:[#allocation10 + $0xe4] ss:$48 sps:$4 sm:$0xff]  }
  0xf9   :  { %2102 = vmatprep.subr.bf16.mxu1 %v3352_v25  ;;  %v3442_v25 = vld [vmem:[#allocation10 + $0x6e4] ss:$48 sps:$4 sm:$0xff]  }
  0xfb   :  { %2037 = vmatpush1.bf16.msra.mxu0 %v3347_v26  ;;  %v3437_v26 = vld [vmem:[#allocation10 + $0xe0] ss:$48 sps:$4 sm:$0xff]  }
  0xfc   :  { %2103 = vmatpush1.bf16.msra.mxu1 %v3350_v27  ;;  %2038 = vmatprep.subr.bf16.mxu0 %v3355_v28  ;;  %v3440_v27 = vld [vmem:[#allocation10 + $0x6e0] ss:$48 sps:$4 sm:$0xff]   ;;  %v3445_v28 = vld [vmem:[#allocation10 + $0x144] ss:$48 sps:$4 sm:$0xff]  }
  0xfd   :  { %2104 = vmatprep.subr.bf16.mxu1 %v3358_v29  ;;  %v3448_v29 = vld [vmem:[#allocation10 + $0x744] ss:$48 sps:$4 sm:$0xff]  }
  0xff   :  { %2039 = vmatpush1.bf16.msra.mxu0 %v3353_v30  ;;  %v3443_v30 = vld [vmem:[#allocation10 + $0x140] ss:$48 sps:$4 sm:$0xff]  }
 0x100   :  { %2105 = vmatpush1.bf16.msra.mxu1 %v3356_v31  ;;  %2040 = vmatprep.subr.bf16.mxu0 %v3361_v32  ;;  %v3446_v31 = vld [vmem:[#allocation10 + $0x740] ss:$48 sps:$4 sm:$0xff]   ;;  %v3451_v32 = vld [vmem:[#allocation10 + $0x1a4] ss:$48 sps:$4 sm:$0xff]  }
 0x101   :  { %2106 = vmatprep.subr.bf16.mxu1 %v3364_v33  ;;  %v3454_v33 = vld [vmem:[#allocation10 + $0x7a4] ss:$48 sps:$4 sm:$0xff]  }
 0x103   :  { %2041 = vmatpush1.bf16.msra.mxu0 %v3359_v34  ;;  %v3449_v34 = vld [vmem:[#allocation10 + $0x1a0] ss:$48 sps:$4 sm:$0xff]  }
 0x104   :  { %2107 = vmatpush1.bf16.msra.mxu1 %v3362_v35  ;;  %2042 = vmatprep.subr.bf16.mxu0 %v3367_v36  ;;  %v3452_v35 = vld [vmem:[#allocation10 + $0x7a0] ss:$48 sps:$4 sm:$0xff]   ;;  %v3457_v36 = vld [vmem:[#allocation10 + $0x204] ss:$48 sps:$4 sm:$0xff]  }
 0x105   :  { %2108 = vmatprep.subr.bf16.mxu1 %v3370_v37  ;;  %v3460_v37 = vld [vmem:[#allocation10 + $0x804] ss:$48 sps:$4 sm:$0xff]  }
 0x107   :  { %2043 = vmatpush1.bf16.msra.mxu0 %v3365_v39  ;;  %v3455_v39 = vld [vmem:[#allocation10 + $0x200] ss:$48 sps:$4 sm:$0xff]  }
 0x108   :  { %2109 = vmatpush1.bf16.msra.mxu1 %v3368_v40  ;;  %2044 = vmatprep.subr.bf16.mxu0 %v3373_v41  ;;  %v3458_v40 = vld [vmem:[#allocation10 + $0x800] ss:$48 sps:$4 sm:$0xff]   ;;  %v3463_v41 = vld [vmem:[#allocation10 + $0x264] ss:$48 sps:$4 sm:$0xff]  }
 0x109   :  { %2110 = vmatprep.subr.bf16.mxu1 %v3376_v42  ;;  %v3466_v42 = vld [vmem:[#allocation10 + $0x864] ss:$48 sps:$4 sm:$0xff]  }
 0x10b   :  { %2045 = vmatpush1.bf16.msra.mxu0 %v3371_v43  ;;  %v3461_v43 = vld [vmem:[#allocation10 + $0x260] ss:$48 sps:$4 sm:$0xff]  }
 0x10c   :  { %2111 = vmatpush1.bf16.msra.mxu1 %v3374_v44  ;;  %2137 = vmatprep.subr.bf16.mxu0 %v3382_v46  ;;  %v3464_v44 = vld [vmem:[#allocation10 + $0x860] ss:$48 sps:$4 sm:$0xff]   ;;  %v3472_v46 = vld [vmem:[#allocation10 + $0x8c4] ss:$48 sps:$4 sm:$0xff]  }
 0x10d   :  { %2112 = vmatprep.subr.bf16.mxu1 %v3379_v45  ;;  %v3469_v45 = vld [vmem:[#allocation10 + $0x2c4] ss:$48 sps:$4 sm:$0xff]  }
 0x10e   :  { %2047 = vmatmul.mubr.bf16.vlgmr.msra.gmra.mrb[8].mxu0 %v3943_v9 }
 0x10f   :  { %2138 = vmatpush1.bf16.msra.mxu0 %v3380_v48  ;;  %2169 = vmatprep.mubr.bf16.mxu0 %v3807_v0  ;;  %v3470_v48 = vld [vmem:[#allocation10 + $0x8c0] ss:$48 sps:$4 sm:$0xff]  }
 0x110   :  { %2113 = vmatpush1.bf16.msra.mxu1 %v3377_v47  ;;  %2139 = vmatprep.subr.bf16.mxu0 %v3388_v50  ;;  %v3467_v47 = vld [vmem:[#allocation10 + $0x2c0] ss:$48 sps:$4 sm:$0xff]   ;;  %v3478_v50 = vld [vmem:[#allocation10 + $0x2c] ss:$48 sps:$4 sm:$0xff]  }
 0x111   :  { %2114 = vmatprep.subr.bf16.mxu1 %v3385_v49  ;;  %v3475_v49 = vld [vmem:[#allocation10 + $0x324] ss:$48 sps:$4 sm:$0xff]  }
 0x113   :  { %2140 = vmatpush1.bf16.msra.mxu0 %v3386_v52  ;;  %v3476_v52 = vld [vmem:[#allocation10 + $0x28] ss:$48 sps:$4 sm:$0xff]  }
 0x114   :  { %2115 = vmatpush1.bf16.msra.mxu1 %v3383_v51  ;;  %2141 = vmatprep.subr.bf16.mxu0 %v3394_v55  ;;  %v3473_v51 = vld [vmem:[#allocation10 + $0x320] ss:$48 sps:$4 sm:$0xff]   ;;  %v3484_v55 = vld [vmem:[#allocation10 + $0x8c] ss:$48 sps:$4 sm:$0xff]  }
 0x115   :  { %2116 = vmatprep.subr.bf16.mxu1 %v3391_v54  ;;  %v3481_v54 = vld [vmem:[#allocation10 + $0x384] ss:$48 sps:$4 sm:$0xff]  }
 0x117   :  { %2142 = vmatpush1.bf16.msra.mxu0 %v3392_v57  ;;  %v3482_v57 = vld [vmem:[#allocation10 + $0x88] ss:$48 sps:$4 sm:$0xff]  }
 0x118   :  { %2117 = vmatpush1.bf16.msra.mxu1 %v3389_v56  ;;  %2143 = vmatprep.subr.bf16.mxu0 %v3400_v59  ;;  %v3479_v56 = vld [vmem:[#allocation10 + $0x380] ss:$48 sps:$4 sm:$0xff]   ;;  %v3490_v59 = vld [vmem:[#allocation10 + $0xec] ss:$48 sps:$4 sm:$0xff]  }
 0x119   :  { %2118 = vmatprep.subr.bf16.mxu1 %v3397_v58  ;;  %v3487_v58 = vld [vmem:[#allocation10 + $0x3e4] ss:$48 sps:$4 sm:$0xff]  }
 0x11b   :  { %2144 = vmatpush1.bf16.msra.mxu0 %v3398_v61  ;;  %v3488_v61 = vld [vmem:[#allocation10 + $0xe8] ss:$48 sps:$4 sm:$0xff]  }
 0x11c   :  { %2119 = vmatpush1.bf16.msra.mxu1 %v3395_v60  ;;  %2145 = vmatprep.subr.bf16.mxu0 %v3406_v63  ;;  %v3485_v60 = vld [vmem:[#allocation10 + $0x3e0] ss:$48 sps:$4 sm:$0xff]   ;;  %v3496_v63 = vld [vmem:[#allocation10 + $0x14c] ss:$48 sps:$4 sm:$0xff]  }
 0x11d   :  { %2120 = vmatprep.subr.bf16.mxu1 %v3403_v62  ;;  %v3493_v62 = vld [vmem:[#allocation10 + $0x444] ss:$48 sps:$4 sm:$0xff]  }
 0x11f   :  { %2146 = vmatpush1.bf16.msra.mxu0 %v3404_v2  ;;  %v3494_v2 = vld [vmem:[#allocation10 + $0x148] ss:$48 sps:$4 sm:$0xff]  }
 0x120   :  { %2121 = vmatpush1.bf16.msra.mxu1 %v3401_v1  ;;  %2147 = vmatprep.subr.bf16.mxu0 %v3412_v4  ;;  %v3491_v1 = vld [vmem:[#allocation10 + $0x440] ss:$48 sps:$4 sm:$0xff]   ;;  %v3502_v4 = vld [vmem:[#allocation10 + $0x1ac] ss:$48 sps:$4 sm:$0xff]  }
 0x121   :  { %2122 = vmatprep.subr.bf16.mxu1 %v3409_v3  ;;  %v3499_v3 = vld [vmem:[#allocation10 + $0x4a4] ss:$48 sps:$4 sm:$0xff]  }
 0x123   :  { %2148 = vmatpush1.bf16.msra.mxu0 %v3410_v6  ;;  %v3505_v6 = vld [vmem:[#allocation10 + $0x504] ss:$48 sps:$4 sm:$0xff]  }
 0x124   :  { %2123 = vmatpush1.bf16.msra.mxu1 %v3407_v5  ;;  %2149 = vmatprep.subr.bf16.mxu0 %v3418_v8  ;;  %v3497_v5 = vld [vmem:[#allocation10 + $0x4a0] ss:$48 sps:$4 sm:$0xff]  }
 0x125   :  { %2124 = vmatprep.subr.bf16.mxu1 %v3415_v7  ;;  %v3508_v7 = vld [vmem:[#allocation10 + $0x20c] ss:$48 sps:$4 sm:$0xff]   ;;  %v3503_v8 = vld [vmem:[#allocation10 + $0x500] ss:$48 sps:$4 sm:$0xff]  }
 0x127   :  { %2150 = vmatpush1.bf16.msra.mxu0 %v3416_v11  ;;  %v3511_v11 = vld [vmem:[#allocation10 + $0x564] ss:$48 sps:$4 sm:$0xff]  }
 0x128   :  { %2125 = vmatpush1.bf16.msra.mxu1 %v3413_v10  ;;  %2151 = vmatprep.subr.bf16.mxu0 %v3424_v13  ;;  %v3506_v10 = vld [vmem:[#allocation10 + $0x208] ss:$48 sps:$4 sm:$0xff]  }
 0x129   :  { %2126 = vmatprep.subr.bf16.mxu1 %v3421_v12  ;;  %v3514_v12 = vld [vmem:[#allocation10 + $0x26c] ss:$48 sps:$4 sm:$0xff]  }
 0x12b   :  { %2152 = vmatpush1.bf16.msra.mxu0 %v3422_v15  ;;  %v3509_v15 = vld [vmem:[#allocation10 + $0x560] ss:$48 sps:$4 sm:$0xff]  }
 0x12c   :  { %2127 = vmatpush1.bf16.msra.mxu1 %v3419_v14  ;;  %2178 = vmatprep.subr.bf16.mxu0 %v3427_v16  ;;  %v3512_v16 = vld [vmem:[#allocation10 + $0x268] ss:$48 sps:$4 sm:$0xff]  }
 0x12d   :  { %2219 = vmatprep.subr.bf16.mxu1 %v3430_v17 }
 0x12e   :  { %2170 = vmatmul.mubr.bf16.vlgmr.msra.gmra.mrb[12].mxu0 %v3936_v38 }
 0x12f   :  { %2129 = vmatmul.mubr.bf16.vlgmr.msra.gmra.mrb[12].mxu1 %v3943_v9  ;;  %2179 = vmatpush1.bf16.msra.mxu0 %v3425_v18 }
 0x130   :  { %2220 = vmatpush1.bf16.msra.mxu1 %v3428_v19  ;;  %2180 = vmatprep.subr.bf16.mxu0 %v3433_v20  ;;  %v3517_v19 = vld [vmem:[#allocation10 + $0x5c4] ss:$48 sps:$4 sm:$0xff]   ;;  %v3520_v20 = vld [vmem:[#allocation10 + $0x2cc] ss:$48 sps:$4 sm:$0xff]  }
 0x131   :  { %2221 = vmatprep.subr.bf16.mxu1 %v3436_v21  ;;  %2251 = vmatprep.mubr.bf16.mxu1 %v3807_v0  ;;  %v3515_v21 = vld [vmem:[#allocation10 + $0x5c0] ss:$48 sps:$4 sm:$0xff]  }
 0x132   :  { %2210 = vmatprep.mubr.bf16.mxu0 %v3939_v53 }
 0x133   :  { %2181 = vmatpush1.bf16.msra.mxu0 %v3431_v22  ;;  %v3518_v22 = vld [vmem:[#allocation10 + $0x2c8] ss:$48 sps:$4 sm:$0xff]  }
 0x134   :  { %2222 = vmatpush1.bf16.msra.mxu1 %v3434_v23  ;;  %2182 = vmatprep.subr.bf16.mxu0 %v3439_v24  ;;  %v3523_v23 = vld [vmem:[#allocation10 + $0x32c] ss:$48 sps:$4 sm:$0xff]  }
 0x135   :  { %2223 = vmatprep.subr.bf16.mxu1 %v3442_v25  ;;  %v3526_v24 = vld [vmem:[#allocation10 + $0x62c] ss:$48 sps:$4 sm:$0xff]   ;;  %v3521_v25 = vld [vmem:[#allocation10 + $0x328] ss:$48 sps:$4 sm:$0xff]  }
 0x137   :  { %2183 = vmatpush1.bf16.msra.mxu0 %v3437_v26  ;;  %v3524_v26 = vld [vmem:[#allocation10 + $0x628] ss:$48 sps:$4 sm:$0xff]  }
 0x138   :  { %2224 = vmatpush1.bf16.msra.mxu1 %v3440_v27  ;;  %2184 = vmatprep.subr.bf16.mxu0 %v3445_v28  ;;  %v3529_v27 = vld [vmem:[#allocation10 + $0x38c] ss:$48 sps:$4 sm:$0xff]  }
 0x139   :  { %2225 = vmatprep.subr.bf16.mxu1 %v3448_v29  ;;  %v3532_v28 = vld [vmem:[#allocation10 + $0x68c] ss:$48 sps:$4 sm:$0xff]   ;;  %v3527_v29 = vld [vmem:[#allocation10 + $0x388] ss:$48 sps:$4 sm:$0xff]  }
 0x13b   :  { %2185 = vmatpush1.bf16.msra.mxu0 %v3443_v30  ;;  %v3530_v30 = vld [vmem:[#allocation10 + $0x688] ss:$48 sps:$4 sm:$0xff]  }
 0x13c   :  { %2226 = vmatpush1.bf16.msra.mxu1 %v3446_v31  ;;  %2186 = vmatprep.subr.bf16.mxu0 %v3451_v32  ;;  %v3535_v31 = vld [vmem:[#allocation10 + $0x3ec] ss:$48 sps:$4 sm:$0xff]  }
 0x13d   :  { %2227 = vmatprep.subr.bf16.mxu1 %v3454_v33  ;;  %v3538_v32 = vld [vmem:[#allocation10 + $0x6ec] ss:$48 sps:$4 sm:$0xff]   ;;  %v3533_v33 = vld [vmem:[#allocation10 + $0x3e8] ss:$48 sps:$4 sm:$0xff]  }
 0x13f   :  { %2187 = vmatpush1.bf16.msra.mxu0 %v3449_v34  ;;  %v3536_v34 = vld [vmem:[#allocation10 + $0x6e8] ss:$48 sps:$4 sm:$0xff]  }
 0x140   :  { %2228 = vmatpush1.bf16.msra.mxu1 %v3452_v35  ;;  %2188 = vmatprep.subr.bf16.mxu0 %v3457_v36  ;;  %v3541_v35 = vld [vmem:[#allocation10 + $0x44c] ss:$48 sps:$4 sm:$0xff]  }
 0x141   :  { %2229 = vmatprep.subr.bf16.mxu1 %v3460_v37  ;;  %v3544_v36 = vld [vmem:[#allocation10 + $0x74c] ss:$48 sps:$4 sm:$0xff]   ;;  %v3539_v37 = vld [vmem:[#allocation10 + $0x448] ss:$48 sps:$4 sm:$0xff]  }
 0x143   :  { %2189 = vmatpush1.bf16.msra.mxu0 %v3455_v39  ;;  %v3542_v39 = vld [vmem:[#allocation10 + $0x748] ss:$48 sps:$4 sm:$0xff]  }
 0x144   :  { %2230 = vmatpush1.bf16.msra.mxu1 %v3458_v40  ;;  %2190 = vmatprep.subr.bf16.mxu0 %v3463_v41  ;;  %v3547_v40 = vld [vmem:[#allocation10 + $0x4ac] ss:$48 sps:$4 sm:$0xff]  }
 0x145   :  { %2231 = vmatprep.subr.bf16.mxu1 %v3466_v42  ;;  %v3550_v41 = vld [vmem:[#allocation10 + $0x7ac] ss:$48 sps:$4 sm:$0xff]   ;;  %v3545_v42 = vld [vmem:[#allocation10 + $0x4a8] ss:$48 sps:$4 sm:$0xff]  }
 0x147   :  { %2191 = vmatpush1.bf16.msra.mxu0 %v3461_v43  ;;  %v3548_v43 = vld [vmem:[#allocation10 + $0x7a8] ss:$48 sps:$4 sm:$0xff]  }
 0x148   :  { %2232 = vmatpush1.bf16.msra.mxu1 %v3464_v44  ;;  %2192 = vmatprep.subr.bf16.mxu0 %v3469_v45  ;;  %v3553_v44 = vld [vmem:[#allocation10 + $0x50c] ss:$48 sps:$4 sm:$0xff]  }
 0x149   :  { %2233 = vmatprep.subr.bf16.mxu1 %v3472_v46  ;;  %v3556_v45 = vld [vmem:[#allocation10 + $0x80c] ss:$48 sps:$4 sm:$0xff]   ;;  %v3551_v46 = vld [vmem:[#allocation10 + $0x508] ss:$48 sps:$4 sm:$0xff]  }
 0x14b   :  { %2193 = vmatpush1.bf16.msra.mxu0 %v3467_v47  ;;  %v3554_v47 = vld [vmem:[#allocation10 + $0x808] ss:$48 sps:$4 sm:$0xff]  }
 0x14c   :  { %2234 = vmatpush1.bf16.msra.mxu1 %v3470_v48  ;;  %2194 = vmatprep.subr.bf16.mxu0 %v3475_v49  ;;  %v3559_v48 = vld [vmem:[#allocation10 + $0x56c] ss:$48 sps:$4 sm:$0xff]  }
 0x14d   :  { %2260 = vmatprep.subr.bf16.mxu1 %v3478_v50  ;;  %v3562_v49 = vld [vmem:[#allocation10 + $0x86c] ss:$48 sps:$4 sm:$0xff]  }
 0x14f   :  { %2252 = vmatmul.mubr.bf16.vlgmr.msra.gmra.mrb[16].mxu1 %v3936_v38  ;;  %2195 = vmatpush1.bf16.msra.mxu0 %v3473_v51 }
 0x150   :  { %2261 = vmatpush1.bf16.msra.mxu1 %v3476_v52  ;;  %2196 = vmatprep.subr.bf16.mxu0 %v3481_v54 }
 0x151   :  { %2262 = vmatprep.subr.bf16.mxu1 %v3484_v55  ;;  %2292 = vmatprep.mubr.bf16.mxu1 %v3939_v53  ;;  %v3500_v53 = vld [vmem:[#allocation10 + $0x1a8] ss:$48 sps:$4 sm:$0xff]  }
 0x153   :  { %2197 = vmatpush1.bf16.msra.mxu0 %v3479_v56  ;;  %v3557_v56 = vld [vmem:[#allocation10 + $0x568] ss:$48 sps:$4 sm:$0xff]  }
 0x154   :  { %2263 = vmatpush1.bf16.msra.mxu1 %v3482_v57  ;;  %2198 = vmatprep.subr.bf16.mxu0 %v3487_v58  ;;  %v3560_v57 = vld [vmem:[#allocation10 + $0x868] ss:$48 sps:$4 sm:$0xff]  }
 0x155   :  { %2264 = vmatprep.subr.bf16.mxu1 %v3490_v59  ;;  %v3565_v59 = vld [vmem:[#allocation10 + $0x5cc] ss:$48 sps:$4 sm:$0xff]  }
 0x157   :  { %2199 = vmatpush1.bf16.msra.mxu0 %v3485_v60  ;;  %v3568_v60 = vld [vmem:[#allocation10 + $0x8cc] ss:$48 sps:$4 sm:$0xff]  }
 0x158   :  { %2265 = vmatpush1.bf16.msra.mxu1 %v3488_v61  ;;  %2200 = vmatprep.subr.bf16.mxu0 %v3493_v62  ;;  %v3563_v61 = vld [vmem:[#allocation10 + $0x5c8] ss:$48 sps:$4 sm:$0xff]  }
 0x159   :  { %2266 = vmatprep.subr.bf16.mxu1 %v3496_v63  ;;  %v3566_v62 = vld [vmem:[#allocation10 + $0x8c8] ss:$48 sps:$4 sm:$0xff]   ;;  %v3571_v63 = vld [vmem:[#allocation8 + $0x4] ss:$48 sps:$4 sm:$0xff]  }
 0x15b   :  { %2201 = vmatpush1.bf16.msra.mxu0 %v3491_v1  ;;  %v3574_v1 = vld [vmem:[#allocation8 + $0xc] ss:$48 sps:$4 sm:$0xff]  }
 0x15c   :  { %2267 = vmatpush1.bf16.msra.mxu1 %v3494_v2  ;;  %2202 = vmatprep.subr.bf16.mxu0 %v3499_v3  ;;  %v3569_v2 = vld [vmem:[#allocation8] ss:$48 sps:$4 sm:$0xff]   ;;  %v3572_v3 = vld [vmem:[#allocation8 + $0x8] ss:$48 sps:$4 sm:$0xff]  }
 0x15d   :  { %2268 = vmatprep.subr.bf16.mxu1 %v3502_v4  ;;  %v3577_v4 = vld [vmem:[#allocation8 + $0x14] ss:$48 sps:$4 sm:$0xff]  }
 0x15f   :  { %2203 = vmatpush1.bf16.msra.mxu0 %v3497_v5  ;;  %v3580_v5 = vld [vmem:[#allocation8 + $0x1c] ss:$48 sps:$4 sm:$0xff]  }
 0x160   :  { %2269 = vmatpush1.bf16.msra.mxu1 %v3500_v53  ;;  %2204 = vmatprep.subr.bf16.mxu0 %v3505_v6  ;;  %v102_v53 = vld [vmem:[#allocation2] sm:$0xff] }
 0x161   :  { %2270 = vmatprep.subr.bf16.mxu1 %v3508_v7  ;;  %v103_v6 = vpack.c.bf16 %v102_v53, %v102_v53  ;;  %v3575_v7 = vld [vmem:[#allocation8 + $0x10] ss:$48 sps:$4 sm:$0xff]  }
 0x162   :  { %v3961_v13 = vpop.f32.mrb[0].mxu1  ;;  %v4009_v53 = vld [vmem:[#allocation11] sm:$0xff] }
 0x163   :  { %v3963_v14 = vpop.f32.mrb[1].mxu1  ;;  %2205 = vmatpush1.bf16.msra.mxu0 %v3503_v8  ;;  %v3578_v8 = vld [vmem:[#allocation8 + $0x18] ss:$48 sps:$4 sm:$0xff]  }
 0x164   :  { %2271 = vmatpush1.bf16.msra.mxu1 %v3506_v10  ;;  %v1929_v17 = vpop.f32.mrb[2].mxu1  ;;  %2206 = vmatprep.subr.bf16.mxu0 %v3511_v11  ;;  %v3583_v10 = vld [vmem:[#allocation8 + $0x24] ss:$48 sps:$4 sm:$0xff]   ;;  %v3586_v11 = vld [vmem:[#allocation8 + $0x2c] ss:$48 sps:$4 sm:$0xff]  }
 0x165   :  { %2272 = vmatprep.subr.bf16.mxu1 %v3514_v12  ;;  %v1930_v18 = vpop.f32.mrb[3].mxu1 }
 0x167   :  { %2207 = vmatpush1.bf16.msra.mxu0 %v3509_v15 }
 0x168   :  { %2273 = vmatpush1.bf16.msra.mxu1 %v3512_v16  ;;  %2208 = vmatprep.subr.bf16.mxu0 %v3517_v19 }
 0x169   :  { %2274 = vmatprep.subr.bf16.mxu1 %v3520_v20 }
 0x16b   :  { %2209 = vmatpush1.bf16.msra.mxu0 %v3515_v21 }
 0x16c   :  { %2275 = vmatpush1.bf16.msra.mxu1 %v3518_v22  ;;  %2301 = vmatprep.subr.bf16.mxu0 %v3526_v24 }
 0x16d   :  { %2276 = vmatprep.subr.bf16.mxu1 %v3523_v23 }
 0x16e   :  { %2211 = vmatmul.mubr.bf16.vlgmr.msra.gmra.mrb[16].mxu0 %v3943_v9 }
 0x16f   :  { %2302 = vmatpush1.bf16.msra.mxu0 %v3524_v26  ;;  %2333 = vmatprep.mubr.bf16.mxu0 %v3807_v0 }
 0x170   :  { %2277 = vmatpush1.bf16.msra.mxu1 %v3521_v25  ;;  %2303 = vmatprep.subr.bf16.mxu0 %v3532_v28 }
 0x171   :  { %2278 = vmatprep.subr.bf16.mxu1 %v3529_v27 }
 0x173   :  { %2304 = vmatpush1.bf16.msra.mxu0 %v3530_v30 }
 0x174   :  { %2279 = vmatpush1.bf16.msra.mxu1 %v3527_v29  ;;  %2305 = vmatprep.subr.bf16.mxu0 %v3538_v32 }
 0x175   :  { %2280 = vmatprep.subr.bf16.mxu1 %v3535_v31 }
 0x177   :  { %2306 = vmatpush1.bf16.msra.mxu0 %v3536_v34 }
 0x178   :  { %2281 = vmatpush1.bf16.msra.mxu1 %v3533_v33  ;;  %2307 = vmatprep.subr.bf16.mxu0 %v3544_v36 }
 0x179   :  { %2282 = vmatprep.subr.bf16.mxu1 %v3541_v35 }
 0x17b   :  { %2308 = vmatpush1.bf16.msra.mxu0 %v3542_v39 }
 0x17c   :  { %2283 = vmatpush1.bf16.msra.mxu1 %v3539_v37  ;;  %2309 = vmatprep.subr.bf16.mxu0 %v3550_v41 }
 0x17d   :  { %2284 = vmatprep.subr.bf16.mxu1 %v3547_v40 }
 0x17f   :  { %2310 = vmatpush1.bf16.msra.mxu0 %v3548_v43 }
 0x180   :  { %2285 = vmatpush1.bf16.msra.mxu1 %v3545_v42  ;;  %2311 = vmatprep.subr.bf16.mxu0 %v3556_v45 }
 0x181   :  { %2286 = vmatprep.subr.bf16.mxu1 %v3553_v44  ;;  %v1884_v50 = vpop.f32.mrb[0].mxu0 }
 0x182   :  { %v3968_v51 = vadd.f32 %v3961_v13, %v1884_v50  ;;  %v1886_v52 = vpop.f32.mrb[1].mxu0 }
 0x183   :  { %v3971_v54 = vadd.f32 %v3963_v14, %v1886_v52  ;;  %v1888_v55 = vpop.f32.mrb[2].mxu0  ;;  %2312 = vmatpush1.bf16.msra.mxu0 %v3554_v47 }
 0x184   :  { %2287 = vmatpush1.bf16.msra.mxu1 %v3551_v46  ;;  %v1889_v58 = vpop.f32.mrb[3].mxu0  ;;  %2313 = vmatprep.subr.bf16.mxu0 %v3562_v49  ;;  %v2656_v55 = vlaneseq }
 0x185   :  { %2288 = vmatprep.subr.bf16.mxu1 %v3559_v48 }
 0x187   :  { %2314 = vmatpush1.bf16.msra.mxu0 %v3560_v57 }
 0x188   :  { %2289 = vmatpush1.bf16.msra.mxu1 %v3557_v56  ;;  %2315 = vmatprep.subr.bf16.mxu0 %v3568_v60  ;;  %v4001_v56 = vshrl.u32 %v2656_v55, 7 }
 0x189   :  { %2290 = vmatprep.subr.bf16.mxu1 %v3565_v59 }
 0x18b   :  { %2316 = vmatpush1.bf16.msra.mxu0 %v3566_v62 }
 0x18c   :  { %2291 = vmatpush1.bf16.msra.mxu1 %v3563_v61  ;;  %2406 = vmatprep.subr.bf16.mxu0 %v3571_v63 }
 0x18d   :  { %2447 = vmatprep.subr.bf16.mxu1 %v3574_v1 }
 0x18e   :  { %2334 = vmatmul.mubr.bf16.vlgmr.msra.gmra.mrb[20].mxu0 %v3936_v38  ;;  %v3581_v38 = vld [vmem:[#allocation8 + $0x20] ss:$48 sps:$4 sm:$0xff]  }
 0x18f   :  { %2293 = vmatmul.mubr.bf16.vlgmr.msra.gmra.mrb[20].mxu1 %v3943_v9  ;;  %2407 = vmatpush1.bf16.msra.mxu0 %v3569_v2  ;;  %v3584_v9 = vld [vmem:[#allocation8 + $0x28] ss:$48 sps:$4 sm:$0xff]  }
 0x190   :  { %2448 = vmatpush1.bf16.msra.mxu1 %v3572_v3  ;;  %2438 = vmatprep.mubr.bf16.mxu0 %v3807_v0 }
 0x191   :  { %2479 = vmatprep.mubr.bf16.mxu1 %v3807_v0  ;;  %2488 = vmatprep.subr.bf16.mxu0 %v3577_v4  ;;  %v2658_v4 = vsub.s32 0, %v4001_v56 }
 0x192   :  { %2529 = vmatprep.subr.bf16.mxu1 %v3580_v5  ;;  %v2666_v5 = vsub.s32 2, %v4001_v56 }
 0x196   :  { %3120 = vmatmul.mubr.msk.bf16.vlgmr.msra.gmra.mrb[24].mxu0 %vm2402_vm0, %v103_v6 }
 0x197   :  { %3121 = vmatmul.mubr.msk.bf16.vlgmr.msra.gmra.mrb[24].mxu1 %vm2402_vm0, %v103_v6  ;;  %2489 = vmatpush1.bf16.msra.mxu0 %v3575_v7  ;;  %v2659_v7 = vrot.slane %v4009_v53, %v2658_v4 }
 0x198   :  { %2530 = vmatpush1.bf16.msra.mxu1 %v3578_v8  ;;  %2520 = vmatprep.mubr.bf16.mxu0 %v3807_v0  ;;  %v2667_v8 = vrot.slane %v4009_v53, %v2666_v5 }
 0x199   :  { %2561 = vmatprep.mubr.bf16.mxu1 %v3807_v0  ;;  %2570 = vmatprep.subr.bf16.mxu0 %v3583_v10 }
 0x19a   :  { %2611 = vmatprep.subr.bf16.mxu1 %v3586_v11 }
 0x19e   :  { %3122 = vmatmul.mubr.msk.bf16.vlgmr.msra.gmra.mrb[28].mxu0 %vm2402_vm0, %v103_v6 }
 0x19f   :  { %3123 = vmatmul.mubr.msk.bf16.vlgmr.msra.gmra.mrb[28].mxu1 %vm2402_vm0, %v103_v6  ;;  %2571 = vmatpush1.bf16.msra.mxu0 %v3581_v38 }
 0x1a0   :  { %2612 = vmatpush1.bf16.msra.mxu1 %v3584_v9  ;;  %2602 = vmatprep.mubr.bf16.mxu0 %v3807_v0 }
 0x1a1   :  { %2643 = vmatprep.mubr.bf16.mxu1 %v3807_v0  ;;  %v2007_v13 = vpop.f32.mrb[4].mxu0 }
 0x1a2   :  { %v1966_v12 = vpop.f32.mrb[4].mxu1  ;;  %v2009_v16 = vpop.f32.mrb[5].mxu0 }
 0x1a3   :  { %v2008_v14 = vadd.f32 %v2007_v13, %v1966_v12  ;;  %v1968_v15 = vpop.f32.mrb[5].mxu1  ;;  %v2011_v18 = vpop.f32.mrb[6].mxu0 }
 0x1a4   :  { %v3985_v17 = vadd.f32 %v2009_v16, %v1968_v15  ;;  %v1970_v19 = vpop.f32.mrb[6].mxu1  ;;  %v2012_v20 = vpop.f32.mrb[7].mxu0 }
 0x1a5   :  { %v1971_v21 = vpop.f32.mrb[7].mxu1 }
 0x1a6   :  { %3124 = vmatmul.mubr.msk.bf16.vlgmr.msra.gmra.mrb[32].mxu0 %vm2402_vm0, %v103_v6 }
 0x1a7   :  { %3125 = vmatmul.mubr.msk.bf16.vlgmr.msra.gmra.mrb[32].mxu1 %vm2402_vm0, %v103_v6  ;;  %v2662_v6 = vsub.s32 1, %v4001_v56 }
 0x1a9   :  { %v2663_v38 = vrot.slane %v4009_v53, %v2662_v6 }
 0x1c2   :  { %v2089_v22 = vpop.f32.mrb[8].mxu1 }
 0x1c3   :  { %v2091_v23 = vpop.f32.mrb[9].mxu1 }
 0x1c4   :  { %v2093_v24 = vpop.f32.mrb[10].mxu1 }
 0x1c5   :  { %v2094_v25 = vpop.f32.mrb[11].mxu1 }
 0x1c6   :  { %v2682_v25 = vsub.s32 6, %v4001_v56 }
 0x1e1   :  { %v2048_v0 = vpop.f32.mrb[8].mxu0 }
 0x1e2   :  { %v3989_v26 = vadd.f32 %v2089_v22, %v2048_v0  ;;  %v2050_v27 = vpop.f32.mrb[9].mxu0 }
 0x1e3   :  { %v3991_v28 = vadd.f32 %v2091_v23, %v2050_v27  ;;  %v2052_v29 = vpop.f32.mrb[10].mxu0  ;;  %v2686_v27 = vsub.s32 7, %v4001_v56 }
 0x1e4   :  { %v2053_v30 = vpop.f32.mrb[11].mxu0 }
 0x1e5   :  { %v2683_v30 = vrot.slane %v4009_v53, %v2682_v25 }
 0x201   :  { %v2171_v32 = vpop.f32.mrb[12].mxu0 }
 0x202   :  { %v2130_v31 = vpop.f32.mrb[12].mxu1  ;;  %v2173_v35 = vpop.f32.mrb[13].mxu0 }
 0x203   :  { %v3993_v33 = vadd.f32 %v2171_v32, %v2130_v31  ;;  %v2132_v34 = vpop.f32.mrb[13].mxu1  ;;  %v2175_v37 = vpop.f32.mrb[14].mxu0  ;;  %v2687_v31 = vrot.slane %v4009_v53, %v2686_v27 }
 0x204   :  { %v3995_v36 = vadd.f32 %v2173_v35, %v2132_v34  ;;  %v2134_v39 = vpop.f32.mrb[14].mxu1  ;;  %v2176_v40 = vpop.f32.mrb[15].mxu0 }
 0x205   :  { %v2135_v41 = vpop.f32.mrb[15].mxu1 }
 0x222   :  { %v2253_v42 = vpop.f32.mrb[16].mxu1 }
 0x223   :  { %v2255_v43 = vpop.f32.mrb[17].mxu1 }
 0x224   :  { %v2257_v44 = vpop.f32.mrb[18].mxu1 }
 0x225   :  { %v2258_v45 = vpop.f32.mrb[19].mxu1 }
 0x241   :  { %v2212_v46 = vpop.f32.mrb[16].mxu0 }
 0x242   :  { %v3997_v47 = vadd.f32 %v2253_v42, %v2212_v46  ;;  %v2214_v48 = vpop.f32.mrb[17].mxu0 }
 0x243   :  { %v3999_v49 = vadd.f32 %v2255_v43, %v2214_v48  ;;  %v2216_v50 = vpop.f32.mrb[18].mxu0  ;;  %v2670_v43 = vsub.s32 3, %v4001_v56 }
 0x244   :  { %v2217_v52 = vpop.f32.mrb[19].mxu0  ;;  %v2653_v50 = vld [vmem:[#allocation11 + $0x8] sm:$0xf] }
 0x245   :  { %v2674_v52 = vsub.s32 4, %v4001_v56 }
 0x261   :  { %v2335_v58 = vpop.f32.mrb[20].mxu0 }
 0x262   :  { %v2294_v57 = vpop.f32.mrb[20].mxu1  ;;  %v2337_v61 = vpop.f32.mrb[21].mxu0 }
 0x263   :  { %v4003_v59 = vadd.f32 %v2335_v58, %v2294_v57  ;;  %v2296_v60 = vpop.f32.mrb[21].mxu1  ;;  %v2339_v63 = vpop.f32.mrb[22].mxu0  ;;  %v2691_v57 = vrot.slane %v2653_v50, %v2658_v4 }
 0x264   :  { %v4005_v62 = vadd.f32 %v2337_v61, %v2296_v60  ;;  %v2298_v1 = vpop.f32.mrb[22].mxu1  ;;  %v2340_v2 = vpop.f32.mrb[23].mxu0  ;;  %v2695_v60 = vrot.slane %v2653_v50, %v2662_v6  ;;  %v2703_v61 = vrot.slane %v2653_v50, %v2670_v43 }
 0x265   :  { %v2299_v3 = vpop.f32.mrb[23].mxu1  ;;  %v2675_v1 = vrot.slane %v4009_v53, %v2674_v52 }
 0x269   :  { %v2440_v10 = vpop.f32.mrb[24].mxu0 }
 0x26a   :  { %v2481_v11 = vpop.f32.mrb[24].mxu1  ;;  %v2441_v9 = vadd.f32 %v2440_v10, %v3968_v51  ;;  %v2442_v13 = vpop.f32.mrb[25].mxu0 }
 0x26b   :  { %v2482_v12 = vadd.f32 %v2481_v11, %v2008_v14  ;;  %v2483_v15 = vpop.f32.mrb[25].mxu1  ;;  %v2443_v16 = vadd.f32 %v2442_v13, %v3971_v54  ;;  %v2444_v19 = vpop.f32.mrb[26].mxu0 }
 0x26c   :  { %v2484_v18 = vadd.f32 %v2483_v15, %v3985_v17  ;;  %v2485_v20 = vpop.f32.mrb[26].mxu1  ;;  %v2716_v21 = vadd.f32 %v2659_v7, %v2441_v9  ;;  %v2445_v23 = vpop.f32.mrb[27].mxu0  ;;  %v2699_v7 = vrot.slane %v2653_v50, %v2666_v5 }
 0x26d   :  { %v2718_v22 = vadd.f32 %v2667_v8, %v2482_v12  ;;  %v2486_v24 = vpop.f32.mrb[27].mxu1  ;;  %v2717_v0 = vadd.f32 %v2663_v38, %v2443_v16 }
 0x26e   :  { %v2728_v29 = vmul.f32 0.5, %v2716_v21 }
 0x26f   :  { %v2730_v51 = vmul.f32 0.5, %v2718_v22  ;;  %v2729_v14 = vmul.f32 0.5, %v2717_v0 }
 0x270   :  { %3587 = vtanh.f32 %v2728_v29 }
 0x271   :  { %3589 = vtanh.f32 %v2730_v51  ;;  %v2522_v54 = vpop.f32.mrb[28].mxu0 }
 0x272   :  { %v2563_v17 = vpop.f32.mrb[28].mxu1  ;;  %3591 = vtanh.f32 %v2729_v14  ;;  %v2523_v32 = vadd.f32 %v2522_v54, %v3989_v26  ;;  %v2524_v35 = vpop.f32.mrb[29].mxu0 }
 0x273   :  { %v2564_v34 = vadd.f32 %v2563_v17, %v3993_v33  ;;  %v2565_v37 = vpop.f32.mrb[29].mxu1  ;;  %v2525_v39 = vadd.f32 %v2524_v35, %v3991_v28  ;;  %v2526_v41 = vpop.f32.mrb[30].mxu0  ;;  %v2671_v33 = vrot.slane %v4009_v53, %v2670_v43  ;;  %v2678_v28 = vsub.s32 5, %v4001_v56 }
 0x274   :  { %v2566_v40 = vadd.f32 %v2565_v37, %v3995_v36  ;;  %v2567_v42 = vpop.f32.mrb[30].mxu1  ;;  %v2527_v45 = vpop.f32.mrb[31].mxu0  ;;  %v2720_v22 = vadd.f32 %v2675_v1, %v2523_v32  ;;  %v2765_v37 = vld [vmem:[#allocation7 + $0x8] sm:$0xff] }
 0x275   :  { %v2722_v44 = vadd.f32 %v2683_v30, %v2564_v34  ;;  %v2568_v46 = vpop.f32.mrb[31].mxu1  ;;  %v2719_v15 = vadd.f32 %v2671_v33, %v2484_v18  ;;  %v2679_v25 = vrot.slane %v4009_v53, %v2678_v28 }
 0x276   :  { %v2723_v48 = vadd.f32 %v2687_v31, %v2566_v40  ;;  %v2741_v18 = vmul.f32 0.5, %v2720_v22  ;;  %v2764_v31 = vld [vmem:[#allocation7] sm:$0xff] }
 0x277   :  { %v2752_v26 = vmul.f32 0.5, %v2722_v44  ;;  %v2740_v27 = vmul.f32 0.5, %v2719_v15  ;;  %v2721_v30 = vadd.f32 %v2679_v25, %v2525_v39  ;;  %v2766_v39 = vld [vmem:[#allocation7 + $0x10] sm:$0xff] }
 0x278   :  { %v2753_v55 = vmul.f32 0.5, %v2723_v48 }
 0x279   :  { %3593 = vtanh.f32 %v2752_v26  ;;  %v2604_v36 = vpop.f32.mrb[32].mxu0  ;;  %v2742_v35 = vmul.f32 0.5, %v2721_v30 }
 0x27a   :  { %v2645_v58 = vpop.f32.mrb[32].mxu1  ;;  %v3588_v63 = vpop.eup %3587  ;;  %v2605_v2 = vadd.f32 %v2604_v36, %v3997_v47  ;;  %3595 = vtanh.f32 %v2753_v55 }
 0x27b   :  { %v2646_v3 = vadd.f32 %v2645_v58, %v4003_v59  ;;  %v2606_v8 = vpop.f32.mrb[33].mxu0  ;;  %v2647_v10 = vpop.f32.mrb[33].mxu1  ;;  %v2734_v38 = vadd.f32 1.0, %v3588_v63 }
 0x27c   :  { %v3590_v11 = vpop.eup %3589  ;;  %v2607_v4 = vadd.f32 %v2606_v8, %v3999_v49  ;;  %v2648_v56 = vadd.f32 %v2647_v10, %v4005_v62  ;;  %v2608_v9 = vpop.f32.mrb[34].mxu0  ;;  %v2724_v16 = vadd.f32 %v2691_v57, %v2605_v2 }
 0x27d   :  { %v2649_v6 = vpop.f32.mrb[34].mxu1  ;;  %v3592_v12 = vpop.eup %3591  ;;  %v2736_v13 = vadd.f32 1.0, %v3590_v11  ;;  %v2737_v5 = vmul.f32 0.5, %v2734_v38  ;;  %v2726_v49 = vadd.f32 %v2699_v7, %v2646_v3 }
 0x27e   :  { %v2609_v19 = vpop.f32.mrb[35].mxu0  ;;  %v2650_v47 = vpop.f32.mrb[35].mxu1  ;;  %v2735_v20 = vadd.f32 1.0, %v3592_v12  ;;  %v2725_v59 = vadd.f32 %v2695_v60, %v2607_v4  ;;  %v2727_v21 = vadd.f32 %v2703_v61, %v2648_v56  ;;  %v2754_v23 = vmul.f32 0.5, %v2724_v16 }
 0x27f   :  { %v2739_v24 = vmul.f32 0.5, %v2736_v13 }
 0x280   :  { %v2738_v0 = vmul.f32 0.5, %v2735_v20  ;;  %v2770_v62 = vmul.f32 %v2737_v5, %v2725_v59  ;;  %3597 = vtanh.f32 %v2754_v23 }
 0x281   :  { %v2772_v29 = vmul.f32 %v2739_v24, %v2727_v21  ;;  %3599 = vtanh.f32 %v2740_v27 }
 0x282   :  { %v2771_v51 = vmul.f32 %v2738_v0, %v2726_v49  ;;  %3601 = vtanh.f32 %v2741_v18 }
 0x283   :  { %v3594_v14 = vpop.eup %3593  ;;  %3603 = vtanh.f32 %v2742_v35 }
 0x284   :  { %v2758_v54 = vadd.f32 1.0, %v3594_v14  ;;  %v3596_v17 = vpop.eup %3595 }
 0x285   :  { %v2759_v34 = vadd.f32 1.0, %v3596_v17 }
 0x286   :  { %v2761_v32 = vmul.f32 0.5, %v2758_v54 }
 0x287   :  { %v2762_v53 = vmul.f32 0.5, %v2759_v34 }
 0x288   :  { %v2767_v40 = vmul.f32 %v2764_v31, %v2761_v32 }
 0x289   :  { %v2768_v42 = vmul.f32 %v2765_v37, %v2762_v53 }
 0x28a   :  { %v3598_v41 = vpop.eup %3597  ;;  %v2773_v43 = vadd.f32 %v2770_v62, %v2767_v40 }
 0x28b   :  { %v2760_v44 = vadd.f32 1.0, %v3598_v41  ;;  %v2774_v45 = vadd.f32 %v2771_v51, %v2768_v42  ;;  %v3600_v48 = vpop.eup %3599 }
 0x28c   :  { %3605 = vtanh.f32 %v2773_v43  ;;  %2785 = vst [vmem:[#allocation14] sm:$0xff] %v2773_v43  ;;  %v3602_v52 = vpop.eup %3601  ;;  %v2746_v26 = vadd.f32 1.0, %v3600_v48 }
 0x28d   :  { %v2763_v46 = vmul.f32 0.5, %v2760_v44  ;;  %3607 = vtanh.f32 %v2774_v45  ;;  %2786 = vst [vmem:[#allocation14 + $0x8] sm:$0xff] %v2774_v45  ;;  %v2747_v33 = vadd.f32 1.0, %v3602_v52 }
 0x28f   :  { %v2769_v50 = vmul.f32 %v2766_v39, %v2763_v46 }
 0x291   :  { %v2775_v55 = vadd.f32 %v2772_v29, %v2769_v50 }
 0x293   :  { %3609 = vtanh.f32 %v2775_v55  ;;  %2787 = vst [vmem:[#allocation14 + $0x10] sm:$0xff] %v2775_v55 }
 0x294   :  { %3754 = shalt.err (!%p3751_p10)
}
 0x295   :  { %s3755_s26 = scalar_lea.hbm %s4067_s7, 384 }
 0x296   :  { %p3756_p11 = scmp.ne.s32.totalorder %s4067_s7, %s3755_s26  ;;  %p3759_p12 = scmp.lt.u32.totalorder %s3755_s26, %s4067_s7 }
 0x298   :  { %p3761_p13 = pnand %p3759_p12, %p3756_p11 }
 0x29a   :  { %3764 = shalt.err (!%p3761_p13)
}
 0x29b   :  { %2807 = dma.vmem_to_hbm [thread:$0]  %s2805_s23, 384, %s4067_s7, [#allocation15]   ;;  %v3604_v57 = vpop.eup %3603  ;;  %v2749_v28 = vmul.f32 0.5, %v2746_v26  ;;  %v2750_v58 = vmul.f32 0.5, %v2747_v33 }
 0x29c   :  { %v3606_v36 = vpop.eup %3605  ;;  %v2748_v63 = vadd.f32 1.0, %v3604_v57  ;;  %s3809_s12 = smov [#allocation13]  }
 0x29d   :  { %v2779_v60 = vmul.f32 %v3606_v36, %v2749_v28  ;;  %v3608_v61 = vpop.eup %3607  ;;  %s2794_s13 = sshll.u32 %s3809_s12, 4  ;;  %s2795_s13 = int_to_ptr.vmem [resolvable:$true] %s2794_s13 }
 0x29e   :  { %v2780_v1 = vmul.f32 %v3608_v61, %v2750_v58  ;;  %v2751_v2 = vmul.f32 0.5, %v2748_v63  ;;  %v3610_v3 = vpop.eup %3609  ;;  %s3765_s14 = scalar_lea.vmem %s2795_s13, 384  ;;  %p3770_p1 = scmp.lt.s32.totalorder %s2795_s13, %s2795_s13 }
 0x29f   :  { %2782 = vst [vmem:[#allocation13] sm:$0xff] %v2779_v60  ;;  %p3766_p0 = scmp.ne.s32.totalorder %s2795_s13, %s3765_s14  ;;  %p3771_p2 = scmp.lt.s32.totalorder %s3765_s14, %s3765_s14 }
 0x2a0   :  { %2783 = vst [vmem:[#allocation13 + $0x8] sm:$0xff] %v2780_v1  ;;  %v2781_v7 = vmul.f32 %v3610_v3, %v2751_v2 }
 0x2a1   :  { %p3772_p3 = por %p3771_p2, %p3770_p1 }
 0x2a2   :  { %2784 = vst [vmem:[#allocation13 + $0x10] sm:$0xff] %v2781_v7 }
 0x2a3   :  { %p3773_p4 = pnand %p3772_p3, %p3766_p0 }
 0x2a5   :  { %3776 = shalt.err (!%p3773_p4)
}
 0x2a6   :  { %s3777_s2 = scalar_lea.hbm %s4066_s6, 384 }
 0x2a7   :  { %p3778_p5 = scmp.ne.s32.totalorder %s4066_s6, %s3777_s2  ;;  %p3781_p6 = scmp.lt.u32.totalorder %s3777_s2, %s4066_s6 }
 0x2a9   :  { %p3783_p7 = pnand %p3781_p6, %p3778_p5 }
 0x2ab   :  { %3786 = shalt.err (!%p3783_p7)
}
 0x2ac   :  { %2797 = dma.vmem_to_hbm [thread:$0]  %s2795_s13, 384, %s4066_s6, [#allocation4]  }
 0x2ad   :  { %3795 = dma.done.wait [#allocation4], 384  }
 0x2ae   :  { %3796 = vsyncadd [#allocation4], 4294966912 }
 0x2af   :  { %3797 = dma.done.wait [#allocation15], 384  }
 0x2b0   :  { %3798 = vsyncadd [#allocation15], 4294966912 }
 0x2b1   :  { %2814 = vsyncpa [#allocation3], 1 }
 0x2b2   :  { %2815 = vsyncpa [#allocation6], 1 }
 0x2b3   :  { %2816 = vsyncpa [#allocation9], 1 }
 0x2b4   :  { %2817 = vsyncpa [#allocation12], 1 }
 0x2b5   :  { %2818 = vsyncpa [#allocation4], 1 }
 0x2b6   :  { %2819 = vsyncpa [#allocation15], 1 }

</bundles_post_ra>
